<compile_context>
chip_gen: v7x
topology: tpu7x:2x2x1
jax: 0.10.0
libtpu: 0.0.40
codegen_flags: <defaults>
</compile_context>

<pallas_src>
import math
import jax
import jax.numpy as jnp
from jax.experimental import pallas as pl
from jax.experimental.pallas import tpu as pltpu

IN_DIM = 8            # in_dim of DPB
DIM = 4               # dim of DPB
LN_EPS = 1e-5
LANES = 128           # TPU lane width; spatial positions per vreg row
ROW_CHUNK = 16        # sublane rows (= 2048 positions) per inner-loop iteration
INV_SQRT2 = 1.0 / math.sqrt(2.0)


def _round_up(v, m):
    return ((v + m - 1) // m) * m


def _cdiv(a, b):
    return -(-a // b)


def dpb_kernel(x_ref, phi_ref, phic_ref,
               wf_ref, bf_ref, csf_ref, ww_ref, bw_ref, csw_ref, wo_ref,
               o_ref):
    """One (spatial-tile, batch) block.

    x_ref   : (IN_DIM, rows, 128)  phi_ref: (c1, rows, 128)  phic_ref: (c2, rows, 128)
    wf/ww   : (IN_DIM, DIM) SMEM (gamma-folded conv weights)    wo: (DIM, DIM) SMEM
    bf/bw   : (1, DIM)  SMEM (LN beta folded through the conv: beta @ W)
    csf/csw : (1, DIM)  SMEM (column sums of the gamma-folded weights)
    o_ref   : (DIM, rows, 128)
    """
    c1 = phi_ref.shape[0]
    rows = x_ref.shape[1]
    inv_c = 1.0 / IN_DIM

    # Hoist all SMEM scalar reads out of the chunk loop.
    wf = [[wf_ref[c, o] for o in range(DIM)] for c in range(IN_DIM)]
    ww = [[ww_ref[c, o] for o in range(DIM)] for c in range(IN_DIM)]
    wo = [[wo_ref[c, o] for o in range(DIM)] for c in range(DIM)]
    bf = [bf_ref[0, o] for o in range(DIM)]
    bw = [bw_ref[0, o] for o in range(DIM)]
    csf = [csf_ref[0, o] for o in range(DIM)]
    csw = [csw_ref[0, o] for o in range(DIM)]

    def ln_conv(load_plane, w, cs, b):
        # LayerNorm over IN_DIM channels folded into the 1x1x1 conv epilogue:
        #   out_o = rstd*raw_o - (mu*rstd)*colsum_o + b_o
        s1 = None
        s2 = None
        raw = [None] * DIM
        for c in range(IN_DIM):
            v = load_plane(c)                         # dense (nrows, 128) plane
            s1 = v if s1 is None else s1 + v
            s2 = v * v if s2 is None else s2 + v * v
            for o in range(DIM):
                t = v * w[c][o]
                raw[o] = t if raw[o] is None else raw[o] + t
        mu = s1 * inv_c
        var = s2 * inv_c - mu * mu
        rstd = jax.lax.rsqrt(var + LN_EPS)
        mu_rstd = mu * rstd
        return [raw[o] * rstd - mu_rstd * cs[o] + b[o] for o in range(DIM)]

    def process(r0, nrows):
        sl = pl.ds(r0, nrows)

        # mask branch: LN([Phi ; Phi_compre]) -> 1x1 conv -> sigmoid.  No concat:
        # channel planes are pulled straight from the two refs.
        def load_mask(c):
            if c < c1:
                return phi_ref[c, sl, :].astype(jnp.float32)
            return phic_ref[c - c1, sl, :].astype(jnp.float32)

        sig = [jax.nn.sigmoid(a) for a in ln_conv(load_mask, ww, csw, bw)]

        # x branch: LN(x) -> 1x1 conv -> exact (erf) GELU, gated by sig.
        def load_x(c):
            return x_ref[c, sl, :].astype(jnp.float32)

        pre = ln_conv(load_x, wf, csf, bf)
        gated = []
        for o in range(DIM):
            a = pre[o]
            g = 0.5 * a * (1.0 + jax.lax.erf(a * INV_SQRT2))   # exact F.gelu
            gated.append(g * sig[o])

        # out conv (DIM x DIM); one dense, lane-aligned store per output channel.
        for o in range(DIM):
            acc = gated[0] * wo[0][o]
            for c in range(1, DIM):
                acc = acc + gated[c] * wo[c][o]
            o_ref[o, sl, :] = acc.astype(o_ref.dtype)

    n_full = rows // ROW_CHUNK
    rem = rows - n_full * ROW_CHUNK

    if n_full > 0:
        def body(j, carry):
            process(pl.multiple_of(j * ROW_CHUNK, ROW_CHUNK), ROW_CHUNK)
            return carry
        jax.lax.fori_loop(0, n_full, body, 0, unroll=2)
    if rem > 0:                                   # static tail (small blocks only)
        process(n_full * ROW_CHUNK, rem)


def dpb_forward(x, phi, phi_compre, params, *, target_tile=131072):
    """x: (B, IN_DIM, D, H, W); phi: (B, c1, D, H, W); phi_compre: (B, c2, D, H, W)
    with c1 + c2 == IN_DIM.  Returns (B, DIM, D, H, W)."""
    B, C, D, H, W = x.shape
    assert C == IN_DIM
    c1 = phi.shape[1]
    c2 = phi_compre.shape[1]
    assert c1 + c2 == IN_DIM

    S = D * H * W
    Sp = _round_up(S, LANES)

    x3 = x.reshape(B, IN_DIM, S)
    p3 = phi.reshape(B, c1, S)
    q3 = phi_compre.reshape(B, c2, S)
    if Sp != S:
        # Only when D*H*W isn't lane aligned: pad < 128 trailing positions so the
        # channel-plane reshape below stays a free reshape.  Typical model shapes
        # (H*W a multiple of 128) take the zero-copy path.
        pad = Sp - S
        x3 = jnp.pad(x3, ((0, 0), (0, 0), (0, pad)))
        p3 = jnp.pad(p3, ((0, 0), (0, 0), (0, pad)))
        q3 = jnp.pad(q3, ((0, 0), (0, 0), (0, pad)))

    rows_total = Sp // LANES
    x4 = x3.reshape(B, IN_DIM, rows_total, LANES)      # channel-plane layout
    p4 = p3.reshape(B, c1, rows_total, LANES)
    q4 = q3.reshape(B, c2, rows_total, LANES)

    # Spatial tile: as many 128-lane rows as fit the target (amortizes the
    # ~0.35us per-grid-step overhead), balanced over the needed grid steps.
    # The last grid block may be ragged; Pallas masks OOB rows on writeback.
    target_rows = max(ROW_CHUNK, target_tile // LANES)
    if rows_total <= target_rows:
        rows_per_tile = rows_total                     # single block = full dim
        n_s = 1
    else:
        n_s0 = _cdiv(rows_total, target_rows)
        rows_per_tile = _round_up(_cdiv(rows_total, n_s0), ROW_CHUNK)
        n_s = _cdiv(rows_total, rows_per_tile)

    # Fold the LayerNorm affine into the 1x1x1 convs:
    #   LN(x) @ W == rstd*(x @ (diag(gamma) @ W)) - (mu*rstd)*colsum + beta @ W
    f32 = jnp.float32
    wf = (params["gamma_n"][:, None] * params["w_fusion"]).astype(f32)   # (8, 4)
    bf = (params["beta_n"] @ params["w_fusion"]).reshape(1, DIM).astype(f32)
    csf = jnp.sum(wf, axis=0).reshape(1, DIM)
    ww = (params["gamma_m"][:, None] * params["w_weight"]).astype(f32)   # (8, 4)
    bw = (params["beta_m"] @ params["w_weight"]).reshape(1, DIM).astype(f32)
    csw = jnp.sum(ww, axis=0).reshape(1, DIM)
    wo = params["w_out"].astype(f32)                                      # (4, 4)

    def plane_spec(nchan):
        return pl.BlockSpec((pl.Squeezed(), nchan, rows_per_tile, LANES),
                            lambda s, b: (b, 0, s, 0))

    smem = pl.BlockSpec(memory_space=pltpu.MemorySpace.SMEM)

    out4 = pl.pallas_call(
        dpb_kernel,
        out_shape=jax.ShapeDtypeStruct((B, DIM, rows_total, LANES), x.dtype),
        grid_spec=pltpu.PrefetchScalarGridSpec(
            num_scalar_prefetch=0,
            grid=(n_s, B),                    # spatial tiles lead (B may be 1)
            in_specs=[
                plane_spec(IN_DIM),           # x
                plane_spec(c1),               # Phi
                plane_spec(c2),               # Phi_compre
                smem, smem, smem,             # w_fusion', b_fusion, colsum_fusion
                smem, smem, smem,             # w_weight', b_weight, colsum_weight
                smem,                         # w_out
            ],
            out_specs=plane_spec(DIM),
        ),
        compiler_params=pltpu.CompilerParams(
            dimension_semantics=("parallel", "parallel"),
            vmem_limit_bytes=40 * 1024 * 1024),
    )(x4, p4, q4, wf, bf, csf, ww, bw, csw, wo)

    out3 = out4.reshape(B, DIM, Sp)
    if Sp != S:
        out3 = out3[:, :, :S]
    return out3.reshape(B, DIM, D, H, W)


def dpb_reference(x, phi, phi_compre, params):
    """Pure-JAX reference mirroring the PyTorch forward (unfused LN affine)."""
    def ln(v, g, b):  # v: (..., C)
        mu = jnp.mean(v, axis=-1, keepdims=True)
        var = jnp.mean((v - mu) ** 2, axis=-1, keepdims=True)
        return (v - mu) / jnp.sqrt(var + LN_EPS) * g + b

    xcl = jnp.transpose(x, (0, 2, 3, 4, 1))
    xn = ln(xcl, params["gamma_n"], params["beta_n"])
    fused = jnp.einsum("bdhwc,co->bdhwo", xn, params["w_fusion"])
    fused = 0.5 * fused * (1.0 + jax.lax.erf(fused / jnp.sqrt(2.0)))

    mcl = jnp.transpose(jnp.concatenate([phi, phi_compre], axis=1), (0, 2, 3, 4, 1))
    mn = ln(mcl, params["gamma_m"], params["beta_m"])
    w = jax.nn.sigmoid(jnp.einsum("bdhwc,co->bdhwo", mn, params["w_weight"]))

    out = jnp.einsum("bdhwc,co->bdhwo", fused * w, params["w_out"])
    return jnp.transpose(out, (0, 4, 1, 2, 3))


def init_params(key):
    """Conv weights ~ trunc_normal(std=0.02) stored as (in, out) (= PyTorch (out,in).T).
    LN gamma/beta mildly randomized so the affine-folding path is exercised."""
    k1, k2, k3, k4, k5, k6, k7 = jax.random.split(key, 7)
    tn = lambda k, shape: 0.02 * jax.random.truncated_normal(
        k, -2.0, 2.0, shape, dtype=jnp.float32)
    return {
        "gamma_n": 1.0 + 0.1 * jax.random.normal(k4, (IN_DIM,), jnp.float32),
        "beta_n": 0.02 * jax.random.normal(k5, (IN_DIM,), jnp.float32),
        "gamma_m": 1.0 + 0.1 * jax.random.normal(k6, (IN_DIM,), jnp.float32),
        "beta_m": 0.02 * jax.random.normal(k7, (IN_DIM,), jnp.float32),
        "w_fusion": tn(k1, (IN_DIM, DIM)),
        "w_weight": tn(k2, (IN_DIM, DIM)),
        "w_out": tn(k3, (DIM, DIM)),
    }


if __name__ == "__main__":
    key = jax.random.PRNGKey(0)
    kp, kx, kph, kpc = jax.random.split(key, 4)
    params = init_params(kp)

    # Case 1: small, lane-aligned (S = 4*8*16 = 512) — single-block path.
    B, Dd, H, W = 2, 4, 8, 16
    c1, c2 = 4, 4
    x = jax.random.normal(kx, (B, IN_DIM, Dd, H, W), dtype=jnp.float32)
    phi = jax.random.normal(kph, (B, c1, Dd, H, W), dtype=jnp.float32)
    phi_compre = jax.random.normal(kpc, (B, c2, Dd, H, W), dtype=jnp.float32)

    out = jax.block_until_ready(dpb_forward(x, phi, phi_compre, params))
    ref = dpb_reference(x, phi, phi_compre, params)
    assert out.shape == (B, DIM, Dd, H, W)
    assert jnp.allclose(out, ref, atol=1e-5, rtol=1e-5), "mismatch (small case)"

    # Case 2: forces the multi-tile grid, ragged last block and the inner
    # fori_loop path (S = 4*8*160 = 5120 -> 40 rows, 16-row tiles, 3 grid steps).
    ka, kb, kc = jax.random.split(key, 3)
    Dd2, H2, W2 = 4, 8, 160
    x2 = jax.random.normal(ka, (B, IN_DIM, Dd2, H2, W2), dtype=jnp.float32)
    phi2 = jax.random.normal(kb, (B, c1, Dd2, H2, W2), dtype=jnp.float32)
    phic2 = jax.random.normal(kc, (B, c2, Dd2, H2, W2), dtype=jnp.float32)

    out2 = jax.block_until_ready(
        dpb_forward(x2, phi2, phic2, params, target_tile=2048))
    ref2 = dpb_reference(x2, phi2, phic2, params)
    assert out2.shape == (B, DIM, Dd2, H2, W2)
    assert jnp.allclose(out2, ref2, atol=1e-5, rtol=1e-5), "mismatch (tiled case)"

    print("KERNEL_OK")
</pallas_src>

<mosaic_0001>
module attributes {stable_mosaic.version = 11 : i64} {
  func.func @dpb_kernel(%arg0: i32, %arg1: i32, %arg2: memref<1x8x4x128xf32, #tpu.memory_space<vmem>>, %arg3: memref<1x4x4x128xf32, #tpu.memory_space<vmem>>, %arg4: memref<1x4x4x128xf32, #tpu.memory_space<vmem>>, %arg5: memref<8x4xf32, #tpu.memory_space<smem>>, %arg6: memref<1x4xf32, #tpu.memory_space<smem>>, %arg7: memref<1x4xf32, #tpu.memory_space<smem>>, %arg8: memref<8x4xf32, #tpu.memory_space<smem>>, %arg9: memref<1x4xf32, #tpu.memory_space<smem>>, %arg10: memref<1x4xf32, #tpu.memory_space<smem>>, %arg11: memref<4x4xf32, #tpu.memory_space<smem>>, %arg12: memref<1x4x4x128xf32, #tpu.memory_space<vmem>>) attributes {dimension_semantics = [#tpu.dimension_semantics<parallel>, #tpu.dimension_semantics<parallel>], iteration_bounds = array<i64: 1, 2>, scalar_prefetch = 0 : i64, scratch_operands = 0 : i64, tpu.core_type = #tpu.core_type<tc>, window_params = [{transform_indices = @transform_0, window_bounds = array<i64: 1, 8, 4, 128>}, {transform_indices = @transform_1, window_bounds = array<i64: 1, 4, 4, 128>}, {transform_indices = @transform_2, window_bounds = array<i64: 1, 4, 4, 128>}, {transform_indices = @transform_3, window_bounds = array<i64: 8, 4>}, {transform_indices = @transform_4, window_bounds = array<i64: 1, 4>}, {transform_indices = @transform_5, window_bounds = array<i64: 1, 4>}, {transform_indices = @transform_6, window_bounds = array<i64: 8, 4>}, {transform_indices = @transform_7, window_bounds = array<i64: 1, 4>}, {transform_indices = @transform_8, window_bounds = array<i64: 1, 4>}, {transform_indices = @transform_9, window_bounds = array<i64: 4, 4>}, {transform_indices = @transform_10, window_bounds = array<i64: 1, 4, 4, 128>}]} {
    %c0 = arith.constant 0 : index
    %c0_0 = arith.constant 0 : index
    %0 = memref.load %arg5[%c0, %c0_0] : memref<8x4xf32, #tpu.memory_space<smem>>
    %c0_1 = arith.constant 0 : index
    %c1 = arith.constant 1 : index
    %1 = memref.load %arg5[%c0_1, %c1] : memref<8x4xf32, #tpu.memory_space<smem>>
    %c0_2 = arith.constant 0 : index
    %c2 = arith.constant 2 : index
    %2 = memref.load %arg5[%c0_2, %c2] : memref<8x4xf32, #tpu.memory_space<smem>>
    %c0_3 = arith.constant 0 : index
    %c3 = arith.constant 3 : index
    %3 = memref.load %arg5[%c0_3, %c3] : memref<8x4xf32, #tpu.memory_space<smem>>
    %c1_4 = arith.constant 1 : index
    %c0_5 = arith.constant 0 : index
    %4 = memref.load %arg5[%c1_4, %c0_5] : memref<8x4xf32, #tpu.memory_space<smem>>
    %c1_6 = arith.constant 1 : index
    %c1_7 = arith.constant 1 : index
    %5 = memref.load %arg5[%c1_6, %c1_7] : memref<8x4xf32, #tpu.memory_space<smem>>
    %c1_8 = arith.constant 1 : index
    %c2_9 = arith.constant 2 : index
    %6 = memref.load %arg5[%c1_8, %c2_9] : memref<8x4xf32, #tpu.memory_space<smem>>
    %c1_10 = arith.constant 1 : index
    %c3_11 = arith.constant 3 : index
    %7 = memref.load %arg5[%c1_10, %c3_11] : memref<8x4xf32, #tpu.memory_space<smem>>
    %c2_12 = arith.constant 2 : index
    %c0_13 = arith.constant 0 : index
    %8 = memref.load %arg5[%c2_12, %c0_13] : memref<8x4xf32, #tpu.memory_space<smem>>
    %c2_14 = arith.constant 2 : index
    %c1_15 = arith.constant 1 : index
    %9 = memref.load %arg5[%c2_14, %c1_15] : memref<8x4xf32, #tpu.memory_space<smem>>
    %c2_16 = arith.constant 2 : index
    %c2_17 = arith.constant 2 : index
    %10 = memref.load %arg5[%c2_16, %c2_17] : memref<8x4xf32, #tpu.memory_space<smem>>
    %c2_18 = arith.constant 2 : index
    %c3_19 = arith.constant 3 : index
    %11 = memref.load %arg5[%c2_18, %c3_19] : memref<8x4xf32, #tpu.memory_space<smem>>
    %c3_20 = arith.constant 3 : index
    %c0_21 = arith.constant 0 : index
    %12 = memref.load %arg5[%c3_20, %c0_21] : memref<8x4xf32, #tpu.memory_space<smem>>
    %c3_22 = arith.constant 3 : index
    %c1_23 = arith.constant 1 : index
    %13 = memref.load %arg5[%c3_22, %c1_23] : memref<8x4xf32, #tpu.memory_space<smem>>
    %c3_24 = arith.constant 3 : index
    %c2_25 = arith.constant 2 : index
    %14 = memref.load %arg5[%c3_24, %c2_25] : memref<8x4xf32, #tpu.memory_space<smem>>
    %c3_26 = arith.constant 3 : index
    %c3_27 = arith.constant 3 : index
    %15 = memref.load %arg5[%c3_26, %c3_27] : memref<8x4xf32, #tpu.memory_space<smem>>
    %c4 = arith.constant 4 : index
    %c0_28 = arith.constant 0 : index
    %16 = memref.load %arg5[%c4, %c0_28] : memref<8x4xf32, #tpu.memory_space<smem>>
    %c4_29 = arith.constant 4 : index
    %c1_30 = arith.constant 1 : index
    %17 = memref.load %arg5[%c4_29, %c1_30] : memref<8x4xf32, #tpu.memory_space<smem>>
    %c4_31 = arith.constant 4 : index
    %c2_32 = arith.constant 2 : index
    %18 = memref.load %arg5[%c4_31, %c2_32] : memref<8x4xf32, #tpu.memory_space<smem>>
    %c4_33 = arith.constant 4 : index
    %c3_34 = arith.constant 3 : index
    %19 = memref.load %arg5[%c4_33, %c3_34] : memref<8x4xf32, #tpu.memory_space<smem>>
    %c5 = arith.constant 5 : index
    %c0_35 = arith.constant 0 : index
    %20 = memref.load %arg5[%c5, %c0_35] : memref<8x4xf32, #tpu.memory_space<smem>>
    %c5_36 = arith.constant 5 : index
    %c1_37 = arith.constant 1 : index
    %21 = memref.load %arg5[%c5_36, %c1_37] : memref<8x4xf32, #tpu.memory_space<smem>>
    %c5_38 = arith.constant 5 : index
    %c2_39 = arith.constant 2 : index
    %22 = memref.load %arg5[%c5_38, %c2_39] : memref<8x4xf32, #tpu.memory_space<smem>>
    %c5_40 = arith.constant 5 : index
    %c3_41 = arith.constant 3 : index
    %23 = memref.load %arg5[%c5_40, %c3_41] : memref<8x4xf32, #tpu.memory_space<smem>>
    %c6 = arith.constant 6 : index
    %c0_42 = arith.constant 0 : index
    %24 = memref.load %arg5[%c6, %c0_42] : memref<8x4xf32, #tpu.memory_space<smem>>
    %c6_43 = arith.constant 6 : index
    %c1_44 = arith.constant 1 : index
    %25 = memref.load %arg5[%c6_43, %c1_44] : memref<8x4xf32, #tpu.memory_space<smem>>
    %c6_45 = arith.constant 6 : index
    %c2_46 = arith.constant 2 : index
    %26 = memref.load %arg5[%c6_45, %c2_46] : memref<8x4xf32, #tpu.memory_space<smem>>
    %c6_47 = arith.constant 6 : index
    %c3_48 = arith.constant 3 : index
    %27 = memref.load %arg5[%c6_47, %c3_48] : memref<8x4xf32, #tpu.memory_space<smem>>
    %c7 = arith.constant 7 : index
    %c0_49 = arith.constant 0 : index
    %28 = memref.load %arg5[%c7, %c0_49] : memref<8x4xf32, #tpu.memory_space<smem>>
    %c7_50 = arith.constant 7 : index
    %c1_51 = arith.constant 1 : index
    %29 = memref.load %arg5[%c7_50, %c1_51] : memref<8x4xf32, #tpu.memory_space<smem>>
    %c7_52 = arith.constant 7 : index
    %c2_53 = arith.constant 2 : index
    %30 = memref.load %arg5[%c7_52, %c2_53] : memref<8x4xf32, #tpu.memory_space<smem>>
    %c7_54 = arith.constant 7 : index
    %c3_55 = arith.constant 3 : index
    %31 = memref.load %arg5[%c7_54, %c3_55] : memref<8x4xf32, #tpu.memory_space<smem>>
    %c0_56 = arith.constant 0 : index
    %c0_57 = arith.constant 0 : index
    %32 = memref.load %arg8[%c0_56, %c0_57] : memref<8x4xf32, #tpu.memory_space<smem>>
    %c0_58 = arith.constant 0 : index
    %c1_59 = arith.constant 1 : index
    %33 = memref.load %arg8[%c0_58, %c1_59] : memref<8x4xf32, #tpu.memory_space<smem>>
    %c0_60 = arith.constant 0 : index
    %c2_61 = arith.constant 2 : index
    %34 = memref.load %arg8[%c0_60, %c2_61] : memref<8x4xf32, #tpu.memory_space<smem>>
    %c0_62 = arith.constant 0 : index
    %c3_63 = arith.constant 3 : index
    %35 = memref.load %arg8[%c0_62, %c3_63] : memref<8x4xf32, #tpu.memory_space<smem>>
    %c1_64 = arith.constant 1 : index
    %c0_65 = arith.constant 0 : index
    %36 = memref.load %arg8[%c1_64, %c0_65] : memref<8x4xf32, #tpu.memory_space<smem>>
    %c1_66 = arith.constant 1 : index
    %c1_67 = arith.constant 1 : index
    %37 = memref.load %arg8[%c1_66, %c1_67] : memref<8x4xf32, #tpu.memory_space<smem>>
    %c1_68 = arith.constant 1 : index
    %c2_69 = arith.constant 2 : index
    %38 = memref.load %arg8[%c1_68, %c2_69] : memref<8x4xf32, #tpu.memory_space<smem>>
    %c1_70 = arith.constant 1 : index
    %c3_71 = arith.constant 3 : index
    %39 = memref.load %arg8[%c1_70, %c3_71] : memref<8x4xf32, #tpu.memory_space<smem>>
    %c2_72 = arith.constant 2 : index
    %c0_73 = arith.constant 0 : index
    %40 = memref.load %arg8[%c2_72, %c0_73] : memref<8x4xf32, #tpu.memory_space<smem>>
    %c2_74 = arith.constant 2 : index
    %c1_75 = arith.constant 1 : index
    %41 = memref.load %arg8[%c2_74, %c1_75] : memref<8x4xf32, #tpu.memory_space<smem>>
    %c2_76 = arith.constant 2 : index
    %c2_77 = arith.constant 2 : index
    %42 = memref.load %arg8[%c2_76, %c2_77] : memref<8x4xf32, #tpu.memory_space<smem>>
    %c2_78 = arith.constant 2 : index
    %c3_79 = arith.constant 3 : index
    %43 = memref.load %arg8[%c2_78, %c3_79] : memref<8x4xf32, #tpu.memory_space<smem>>
    %c3_80 = arith.constant 3 : index
    %c0_81 = arith.constant 0 : index
    %44 = memref.load %arg8[%c3_80, %c0_81] : memref<8x4xf32, #tpu.memory_space<smem>>
    %c3_82 = arith.constant 3 : index
    %c1_83 = arith.constant 1 : index
    %45 = memref.load %arg8[%c3_82, %c1_83] : memref<8x4xf32, #tpu.memory_space<smem>>
    %c3_84 = arith.constant 3 : index
    %c2_85 = arith.constant 2 : index
    %46 = memref.load %arg8[%c3_84, %c2_85] : memref<8x4xf32, #tpu.memory_space<smem>>
    %c3_86 = arith.constant 3 : index
    %c3_87 = arith.constant 3 : index
    %47 = memref.load %arg8[%c3_86, %c3_87] : memref<8x4xf32, #tpu.memory_space<smem>>
    %c4_88 = arith.constant 4 : index
    %c0_89 = arith.constant 0 : index
    %48 = memref.load %arg8[%c4_88, %c0_89] : memref<8x4xf32, #tpu.memory_space<smem>>
    %c4_90 = arith.constant 4 : index
    %c1_91 = arith.constant 1 : index
    %49 = memref.load %arg8[%c4_90, %c1_91] : memref<8x4xf32, #tpu.memory_space<smem>>
    %c4_92 = arith.constant 4 : index
    %c2_93 = arith.constant 2 : index
    %50 = memref.load %arg8[%c4_92, %c2_93] : memref<8x4xf32, #tpu.memory_space<smem>>
    %c4_94 = arith.constant 4 : index
    %c3_95 = arith.constant 3 : index
    %51 = memref.load %arg8[%c4_94, %c3_95] : memref<8x4xf32, #tpu.memory_space<smem>>
    %c5_96 = arith.constant 5 : index
    %c0_97 = arith.constant 0 : index
    %52 = memref.load %arg8[%c5_96, %c0_97] : memref<8x4xf32, #tpu.memory_space<smem>>
    %c5_98 = arith.constant 5 : index
    %c1_99 = arith.constant 1 : index
    %53 = memref.load %arg8[%c5_98, %c1_99] : memref<8x4xf32, #tpu.memory_space<smem>>
    %c5_100 = arith.constant 5 : index
    %c2_101 = arith.constant 2 : index
    %54 = memref.load %arg8[%c5_100, %c2_101] : memref<8x4xf32, #tpu.memory_space<smem>>
    %c5_102 = arith.constant 5 : index
    %c3_103 = arith.constant 3 : index
    %55 = memref.load %arg8[%c5_102, %c3_103] : memref<8x4xf32, #tpu.memory_space<smem>>
    %c6_104 = arith.constant 6 : index
    %c0_105 = arith.constant 0 : index
    %56 = memref.load %arg8[%c6_104, %c0_105] : memref<8x4xf32, #tpu.memory_space<smem>>
    %c6_106 = arith.constant 6 : index
    %c1_107 = arith.constant 1 : index
    %57 = memref.load %arg8[%c6_106, %c1_107] : memref<8x4xf32, #tpu.memory_space<smem>>
    %c6_108 = arith.constant 6 : index
    %c2_109 = arith.constant 2 : index
    %58 = memref.load %arg8[%c6_108, %c2_109] : memref<8x4xf32, #tpu.memory_space<smem>>
    %c6_110 = arith.constant 6 : index
    %c3_111 = arith.constant 3 : index
    %59 = memref.load %arg8[%c6_110, %c3_111] : memref<8x4xf32, #tpu.memory_space<smem>>
    %c7_112 = arith.constant 7 : index
    %c0_113 = arith.constant 0 : index
    %60 = memref.load %arg8[%c7_112, %c0_113] : memref<8x4xf32, #tpu.memory_space<smem>>
    %c7_114 = arith.constant 7 : index
    %c1_115 = arith.constant 1 : index
    %61 = memref.load %arg8[%c7_114, %c1_115] : memref<8x4xf32, #tpu.memory_space<smem>>
    %c7_116 = arith.constant 7 : index
    %c2_117 = arith.constant 2 : index
    %62 = memref.load %arg8[%c7_116, %c2_117] : memref<8x4xf32, #tpu.memory_space<smem>>
    %c7_118 = arith.constant 7 : index
    %c3_119 = arith.constant 3 : index
    %63 = memref.load %arg8[%c7_118, %c3_119] : memref<8x4xf32, #tpu.memory_space<smem>>
    %c0_120 = arith.constant 0 : index
    %c0_121 = arith.constant 0 : index
    %64 = memref.load %arg11[%c0_120, %c0_121] : memref<4x4xf32, #tpu.memory_space<smem>>
    %c0_122 = arith.constant 0 : index
    %c1_123 = arith.constant 1 : index
    %65 = memref.load %arg11[%c0_122, %c1_123] : memref<4x4xf32, #tpu.memory_space<smem>>
    %c0_124 = arith.constant 0 : index
    %c2_125 = arith.constant 2 : index
    %66 = memref.load %arg11[%c0_124, %c2_125] : memref<4x4xf32, #tpu.memory_space<smem>>
    %c0_126 = arith.constant 0 : index
    %c3_127 = arith.constant 3 : index
    %67 = memref.load %arg11[%c0_126, %c3_127] : memref<4x4xf32, #tpu.memory_space<smem>>
    %c1_128 = arith.constant 1 : index
    %c0_129 = arith.constant 0 : index
    %68 = memref.load %arg11[%c1_128, %c0_129] : memref<4x4xf32, #tpu.memory_space<smem>>
    %c1_130 = arith.constant 1 : index
    %c1_131 = arith.constant 1 : index
    %69 = memref.load %arg11[%c1_130, %c1_131] : memref<4x4xf32, #tpu.memory_space<smem>>
    %c1_132 = arith.constant 1 : index
    %c2_133 = arith.constant 2 : index
    %70 = memref.load %arg11[%c1_132, %c2_133] : memref<4x4xf32, #tpu.memory_space<smem>>
    %c1_134 = arith.constant 1 : index
    %c3_135 = arith.constant 3 : index
    %71 = memref.load %arg11[%c1_134, %c3_135] : memref<4x4xf32, #tpu.memory_space<smem>>
    %c2_136 = arith.constant 2 : index
    %c0_137 = arith.constant 0 : index
    %72 = memref.load %arg11[%c2_136, %c0_137] : memref<4x4xf32, #tpu.memory_space<smem>>
    %c2_138 = arith.constant 2 : index
    %c1_139 = arith.constant 1 : index
    %73 = memref.load %arg11[%c2_138, %c1_139] : memref<4x4xf32, #tpu.memory_space<smem>>
    %c2_140 = arith.constant 2 : index
    %c2_141 = arith.constant 2 : index
    %74 = memref.load %arg11[%c2_140, %c2_141] : memref<4x4xf32, #tpu.memory_space<smem>>
    %c2_142 = arith.constant 2 : index
    %c3_143 = arith.constant 3 : index
    %75 = memref.load %arg11[%c2_142, %c3_143] : memref<4x4xf32, #tpu.memory_space<smem>>
    %c3_144 = arith.constant 3 : index
    %c0_145 = arith.constant 0 : index
    %76 = memref.load %arg11[%c3_144, %c0_145] : memref<4x4xf32, #tpu.memory_space<smem>>
    %c3_146 = arith.constant 3 : index
    %c1_147 = arith.constant 1 : index
    %77 = memref.load %arg11[%c3_146, %c1_147] : memref<4x4xf32, #tpu.memory_space<smem>>
    %c3_148 = arith.constant 3 : index
    %c2_149 = arith.constant 2 : index
    %78 = memref.load %arg11[%c3_148, %c2_149] : memref<4x4xf32, #tpu.memory_space<smem>>
    %c3_150 = arith.constant 3 : index
    %c3_151 = arith.constant 3 : index
    %79 = memref.load %arg11[%c3_150, %c3_151] : memref<4x4xf32, #tpu.memory_space<smem>>
    %c0_152 = arith.constant 0 : index
    %c0_153 = arith.constant 0 : index
    %80 = memref.load %arg6[%c0_152, %c0_153] : memref<1x4xf32, #tpu.memory_space<smem>>
    %c0_154 = arith.constant 0 : index
    %c1_155 = arith.constant 1 : index
    %81 = memref.load %arg6[%c0_154, %c1_155] : memref<1x4xf32, #tpu.memory_space<smem>>
    %c0_156 = arith.constant 0 : index
    %c2_157 = arith.constant 2 : index
    %82 = memref.load %arg6[%c0_156, %c2_157] : memref<1x4xf32, #tpu.memory_space<smem>>
    %c0_158 = arith.constant 0 : index
    %c3_159 = arith.constant 3 : index
    %83 = memref.load %arg6[%c0_158, %c3_159] : memref<1x4xf32, #tpu.memory_space<smem>>
    %c0_160 = arith.constant 0 : index
    %c0_161 = arith.constant 0 : index
    %84 = memref.load %arg9[%c0_160, %c0_161] : memref<1x4xf32, #tpu.memory_space<smem>>
    %c0_162 = arith.constant 0 : index
    %c1_163 = arith.constant 1 : index
    %85 = memref.load %arg9[%c0_162, %c1_163] : memref<1x4xf32, #tpu.memory_space<smem>>
    %c0_164 = arith.constant 0 : index
    %c2_165 = arith.constant 2 : index
    %86 = memref.load %arg9[%c0_164, %c2_165] : memref<1x4xf32, #tpu.memory_space<smem>>
    %c0_166 = arith.constant 0 : index
    %c3_167 = arith.constant 3 : index
    %87 = memref.load %arg9[%c0_166, %c3_167] : memref<1x4xf32, #tpu.memory_space<smem>>
    %c0_168 = arith.constant 0 : index
    %c0_169 = arith.constant 0 : index
    %88 = memref.load %arg7[%c0_168, %c0_169] : memref<1x4xf32, #tpu.memory_space<smem>>
    %c0_170 = arith.constant 0 : index
    %c1_171 = arith.constant 1 : index
    %89 = memref.load %arg7[%c0_170, %c1_171] : memref<1x4xf32, #tpu.memory_space<smem>>
    %c0_172 = arith.constant 0 : index
    %c2_173 = arith.constant 2 : index
    %90 = memref.load %arg7[%c0_172, %c2_173] : memref<1x4xf32, #tpu.memory_space<smem>>
    %c0_174 = arith.constant 0 : index
    %c3_175 = arith.constant 3 : index
    %91 = memref.load %arg7[%c0_174, %c3_175] : memref<1x4xf32, #tpu.memory_space<smem>>
    %c0_176 = arith.constant 0 : index
    %c0_177 = arith.constant 0 : index
    %92 = memref.load %arg10[%c0_176, %c0_177] : memref<1x4xf32, #tpu.memory_space<smem>>
    %c0_178 = arith.constant 0 : index
    %c1_179 = arith.constant 1 : index
    %93 = memref.load %arg10[%c0_178, %c1_179] : memref<1x4xf32, #tpu.memory_space<smem>>
    %c0_180 = arith.constant 0 : index
    %c2_181 = arith.constant 2 : index
    %94 = memref.load %arg10[%c0_180, %c2_181] : memref<1x4xf32, #tpu.memory_space<smem>>
    %c0_182 = arith.constant 0 : index
    %c3_183 = arith.constant 3 : index
    %95 = memref.load %arg10[%c0_182, %c3_183] : memref<1x4xf32, #tpu.memory_space<smem>>
    %c0_184 = arith.constant 0 : index
    %c0_185 = arith.constant 0 : index
    %c0_186 = arith.constant 0 : index
    %c0_187 = arith.constant 0 : index
    %96 = vector.load %arg3[%c0_184, %c0_185, %c0_186, %c0_187] : memref<1x4x4x128xf32, #tpu.memory_space<vmem>>, vector<1x1x4x128xf32>
    %97 = vector.shape_cast %96 : vector<1x1x4x128xf32> to vector<4x128xf32>
    %98 = arith.mulf %97, %97 : vector<4x128xf32>
    %99 = vector.broadcast %32 : f32 to vector<4x128xf32>
    %100 = arith.mulf %97, %99 : vector<4x128xf32>
    %101 = vector.broadcast %33 : f32 to vector<4x128xf32>
    %102 = arith.mulf %97, %101 : vector<4x128xf32>
    %103 = vector.broadcast %34 : f32 to vector<4x128xf32>
    %104 = arith.mulf %97, %103 : vector<4x128xf32>
    %105 = vector.broadcast %35 : f32 to vector<4x128xf32>
    %106 = arith.mulf %97, %105 : vector<4x128xf32>
    %c0_188 = arith.constant 0 : index
    %c1_189 = arith.constant 1 : index
    %c0_190 = arith.constant 0 : index
    %c0_191 = arith.constant 0 : index
    %107 = vector.load %arg3[%c0_188, %c1_189, %c0_190, %c0_191] : memref<1x4x4x128xf32, #tpu.memory_space<vmem>>, vector<1x1x4x128xf32>
    %108 = vector.shape_cast %107 : vector<1x1x4x128xf32> to vector<4x128xf32>
    %109 = arith.addf %97, %108 : vector<4x128xf32>
    %110 = arith.mulf %108, %108 : vector<4x128xf32>
    %111 = arith.addf %98, %110 : vector<4x128xf32>
    %112 = vector.broadcast %36 : f32 to vector<4x128xf32>
    %113 = arith.mulf %108, %112 : vector<4x128xf32>
    %114 = arith.addf %100, %113 : vector<4x128xf32>
    %115 = vector.broadcast %37 : f32 to vector<4x128xf32>
    %116 = arith.mulf %108, %115 : vector<4x128xf32>
    %117 = arith.addf %102, %116 : vector<4x128xf32>
    %118 = vector.broadcast %38 : f32 to vector<4x128xf32>
    %119 = arith.mulf %108, %118 : vector<4x128xf32>
    %120 = arith.addf %104, %119 : vector<4x128xf32>
    %121 = vector.broadcast %39 : f32 to vector<4x128xf32>
    %122 = arith.mulf %108, %121 : vector<4x128xf32>
    %123 = arith.addf %106, %122 : vector<4x128xf32>
    %c0_192 = arith.constant 0 : index
    %c2_193 = arith.constant 2 : index
    %c0_194 = arith.constant 0 : index
    %c0_195 = arith.constant 0 : index
    %124 = vector.load %arg3[%c0_192, %c2_193, %c0_194, %c0_195] : memref<1x4x4x128xf32, #tpu.memory_space<vmem>>, vector<1x1x4x128xf32>
    %125 = vector.shape_cast %124 : vector<1x1x4x128xf32> to vector<4x128xf32>
    %126 = arith.addf %109, %125 : vector<4x128xf32>
    %127 = arith.mulf %125, %125 : vector<4x128xf32>
    %128 = arith.addf %111, %127 : vector<4x128xf32>
    %129 = vector.broadcast %40 : f32 to vector<4x128xf32>
    %130 = arith.mulf %125, %129 : vector<4x128xf32>
    %131 = arith.addf %114, %130 : vector<4x128xf32>
    %132 = vector.broadcast %41 : f32 to vector<4x128xf32>
    %133 = arith.mulf %125, %132 : vector<4x128xf32>
    %134 = arith.addf %117, %133 : vector<4x128xf32>
    %135 = vector.broadcast %42 : f32 to vector<4x128xf32>
    %136 = arith.mulf %125, %135 : vector<4x128xf32>
    %137 = arith.addf %120, %136 : vector<4x128xf32>
    %138 = vector.broadcast %43 : f32 to vector<4x128xf32>
    %139 = arith.mulf %125, %138 : vector<4x128xf32>
    %140 = arith.addf %123, %139 : vector<4x128xf32>
    %c0_196 = arith.constant 0 : index
    %c3_197 = arith.constant 3 : index
    %c0_198 = arith.constant 0 : index
    %c0_199 = arith.constant 0 : index
    %141 = vector.load %arg3[%c0_196, %c3_197, %c0_198, %c0_199] : memref<1x4x4x128xf32, #tpu.memory_space<vmem>>, vector<1x1x4x128xf32>
    %142 = vector.shape_cast %141 : vector<1x1x4x128xf32> to vector<4x128xf32>
    %143 = arith.addf %126, %142 : vector<4x128xf32>
    %144 = arith.mulf %142, %142 : vector<4x128xf32>
    %145 = arith.addf %128, %144 : vector<4x128xf32>
    %146 = vector.broadcast %44 : f32 to vector<4x128xf32>
    %147 = arith.mulf %142, %146 : vector<4x128xf32>
    %148 = arith.addf %131, %147 : vector<4x128xf32>
    %149 = vector.broadcast %45 : f32 to vector<4x128xf32>
    %150 = arith.mulf %142, %149 : vector<4x128xf32>
    %151 = arith.addf %134, %150 : vector<4x128xf32>
    %152 = vector.broadcast %46 : f32 to vector<4x128xf32>
    %153 = arith.mulf %142, %152 : vector<4x128xf32>
    %154 = arith.addf %137, %153 : vector<4x128xf32>
    %155 = vector.broadcast %47 : f32 to vector<4x128xf32>
    %156 = arith.mulf %142, %155 : vector<4x128xf32>
    %157 = arith.addf %140, %156 : vector<4x128xf32>
    %c0_200 = arith.constant 0 : index
    %c0_201 = arith.constant 0 : index
    %c0_202 = arith.constant 0 : index
    %c0_203 = arith.constant 0 : index
    %158 = vector.load %arg4[%c0_200, %c0_201, %c0_202, %c0_203] : memref<1x4x4x128xf32, #tpu.memory_space<vmem>>, vector<1x1x4x128xf32>
    %159 = vector.shape_cast %158 : vector<1x1x4x128xf32> to vector<4x128xf32>
    %160 = arith.addf %143, %159 : vector<4x128xf32>
    %161 = arith.mulf %159, %159 : vector<4x128xf32>
    %162 = arith.addf %145, %161 : vector<4x128xf32>
    %163 = vector.broadcast %48 : f32 to vector<4x128xf32>
    %164 = arith.mulf %159, %163 : vector<4x128xf32>
    %165 = arith.addf %148, %164 : vector<4x128xf32>
    %166 = vector.broadcast %49 : f32 to vector<4x128xf32>
    %167 = arith.mulf %159, %166 : vector<4x128xf32>
    %168 = arith.addf %151, %167 : vector<4x128xf32>
    %169 = vector.broadcast %50 : f32 to vector<4x128xf32>
    %170 = arith.mulf %159, %169 : vector<4x128xf32>
    %171 = arith.addf %154, %170 : vector<4x128xf32>
    %172 = vector.broadcast %51 : f32 to vector<4x128xf32>
    %173 = arith.mulf %159, %172 : vector<4x128xf32>
    %174 = arith.addf %157, %173 : vector<4x128xf32>
    %c0_204 = arith.constant 0 : index
    %c1_205 = arith.constant 1 : index
    %c0_206 = arith.constant 0 : index
    %c0_207 = arith.constant 0 : index
    %175 = vector.load %arg4[%c0_204, %c1_205, %c0_206, %c0_207] : memref<1x4x4x128xf32, #tpu.memory_space<vmem>>, vector<1x1x4x128xf32>
    %176 = vector.shape_cast %175 : vector<1x1x4x128xf32> to vector<4x128xf32>
    %177 = arith.addf %160, %176 : vector<4x128xf32>
    %178 = arith.mulf %176, %176 : vector<4x128xf32>
    %179 = arith.addf %162, %178 : vector<4x128xf32>
    %180 = vector.broadcast %52 : f32 to vector<4x128xf32>
    %181 = arith.mulf %176, %180 : vector<4x128xf32>
    %182 = arith.addf %165, %181 : vector<4x128xf32>
    %183 = vector.broadcast %53 : f32 to vector<4x128xf32>
    %184 = arith.mulf %176, %183 : vector<4x128xf32>
    %185 = arith.addf %168, %184 : vector<4x128xf32>
    %186 = vector.broadcast %54 : f32 to vector<4x128xf32>
    %187 = arith.mulf %176, %186 : vector<4x128xf32>
    %188 = arith.addf %171, %187 : vector<4x128xf32>
    %189 = vector.broadcast %55 : f32 to vector<4x128xf32>
    %190 = arith.mulf %176, %189 : vector<4x128xf32>
    %191 = arith.addf %174, %190 : vector<4x128xf32>
    %c0_208 = arith.constant 0 : index
    %c2_209 = arith.constant 2 : index
    %c0_210 = arith.constant 0 : index
    %c0_211 = arith.constant 0 : index
    %192 = vector.load %arg4[%c0_208, %c2_209, %c0_210, %c0_211] : memref<1x4x4x128xf32, #tpu.memory_space<vmem>>, vector<1x1x4x128xf32>
    %193 = vector.shape_cast %192 : vector<1x1x4x128xf32> to vector<4x128xf32>
    %194 = arith.addf %177, %193 : vector<4x128xf32>
    %195 = arith.mulf %193, %193 : vector<4x128xf32>
    %196 = arith.addf %179, %195 : vector<4x128xf32>
    %197 = vector.broadcast %56 : f32 to vector<4x128xf32>
    %198 = arith.mulf %193, %197 : vector<4x128xf32>
    %199 = arith.addf %182, %198 : vector<4x128xf32>
    %200 = vector.broadcast %57 : f32 to vector<4x128xf32>
    %201 = arith.mulf %193, %200 : vector<4x128xf32>
    %202 = arith.addf %185, %201 : vector<4x128xf32>
    %203 = vector.broadcast %58 : f32 to vector<4x128xf32>
    %204 = arith.mulf %193, %203 : vector<4x128xf32>
    %205 = arith.addf %188, %204 : vector<4x128xf32>
    %206 = vector.broadcast %59 : f32 to vector<4x128xf32>
    %207 = arith.mulf %193, %206 : vector<4x128xf32>
    %208 = arith.addf %191, %207 : vector<4x128xf32>
    %c0_212 = arith.constant 0 : index
    %c3_213 = arith.constant 3 : index
    %c0_214 = arith.constant 0 : index
    %c0_215 = arith.constant 0 : index
    %209 = vector.load %arg4[%c0_212, %c3_213, %c0_214, %c0_215] : memref<1x4x4x128xf32, #tpu.memory_space<vmem>>, vector<1x1x4x128xf32>
    %210 = vector.shape_cast %209 : vector<1x1x4x128xf32> to vector<4x128xf32>
    %211 = arith.addf %194, %210 : vector<4x128xf32>
    %212 = arith.mulf %210, %210 : vector<4x128xf32>
    %213 = arith.addf %196, %212 : vector<4x128xf32>
    %214 = vector.broadcast %60 : f32 to vector<4x128xf32>
    %215 = arith.mulf %210, %214 : vector<4x128xf32>
    %216 = arith.addf %199, %215 : vector<4x128xf32>
    %217 = vector.broadcast %61 : f32 to vector<4x128xf32>
    %218 = arith.mulf %210, %217 : vector<4x128xf32>
    %219 = arith.addf %202, %218 : vector<4x128xf32>
    %220 = vector.broadcast %62 : f32 to vector<4x128xf32>
    %221 = arith.mulf %210, %220 : vector<4x128xf32>
    %222 = arith.addf %205, %221 : vector<4x128xf32>
    %223 = vector.broadcast %63 : f32 to vector<4x128xf32>
    %224 = arith.mulf %210, %223 : vector<4x128xf32>
    %225 = arith.addf %208, %224 : vector<4x128xf32>
    %cst = arith.constant 1.250000e-01 : f32
    %226 = vector.broadcast %cst : f32 to vector<4x128xf32>
    %227 = arith.mulf %211, %226 : vector<4x128xf32>
    %cst_216 = arith.constant 1.250000e-01 : f32
    %228 = vector.broadcast %cst_216 : f32 to vector<4x128xf32>
    %229 = arith.mulf %213, %228 : vector<4x128xf32>
    %230 = arith.mulf %227, %227 : vector<4x128xf32>
    %231 = arith.subf %229, %230 : vector<4x128xf32>
    %cst_217 = arith.constant 9.99999974E-6 : f32
    %232 = vector.broadcast %cst_217 : f32 to vector<4x128xf32>
    %233 = arith.addf %231, %232 : vector<4x128xf32>
    %234 = math.rsqrt %233 : vector<4x128xf32>
    %235 = arith.mulf %227, %234 : vector<4x128xf32>
    %236 = arith.mulf %216, %234 : vector<4x128xf32>
    %237 = vector.broadcast %92 : f32 to vector<4x128xf32>
    %238 = arith.mulf %235, %237 : vector<4x128xf32>
    %239 = arith.subf %236, %238 : vector<4x128xf32>
    %240 = vector.broadcast %84 : f32 to vector<4x128xf32>
    %241 = arith.addf %239, %240 : vector<4x128xf32>
    %242 = arith.mulf %219, %234 : vector<4x128xf32>
    %243 = vector.broadcast %93 : f32 to vector<4x128xf32>
    %244 = arith.mulf %235, %243 : vector<4x128xf32>
    %245 = arith.subf %242, %244 : vector<4x128xf32>
    %246 = vector.broadcast %85 : f32 to vector<4x128xf32>
    %247 = arith.addf %245, %246 : vector<4x128xf32>
    %248 = arith.mulf %222, %234 : vector<4x128xf32>
    %249 = vector.broadcast %94 : f32 to vector<4x128xf32>
    %250 = arith.mulf %235, %249 : vector<4x128xf32>
    %251 = arith.subf %248, %250 : vector<4x128xf32>
    %252 = vector.broadcast %86 : f32 to vector<4x128xf32>
    %253 = arith.addf %251, %252 : vector<4x128xf32>
    %254 = arith.mulf %225, %234 : vector<4x128xf32>
    %255 = vector.broadcast %95 : f32 to vector<4x128xf32>
    %256 = arith.mulf %235, %255 : vector<4x128xf32>
    %257 = arith.subf %254, %256 : vector<4x128xf32>
    %258 = vector.broadcast %87 : f32 to vector<4x128xf32>
    %259 = arith.addf %257, %258 : vector<4x128xf32>
    %260 = arith.negf %241 : vector<4x128xf32>
    %261 = math.exp %260 : vector<4x128xf32>
    %cst_218 = arith.constant 1.000000e+00 : f32
    %262 = vector.broadcast %cst_218 : f32 to vector<4x128xf32>
    %263 = arith.addf %262, %261 : vector<4x128xf32>
    %264 = arith.divf %262, %263 : vector<4x128xf32>
    %265 = arith.negf %247 : vector<4x128xf32>
    %266 = math.exp %265 : vector<4x128xf32>
    %cst_219 = arith.constant 1.000000e+00 : f32
    %267 = vector.broadcast %cst_219 : f32 to vector<4x128xf32>
    %268 = arith.addf %267, %266 : vector<4x128xf32>
    %269 = arith.divf %267, %268 : vector<4x128xf32>
    %270 = arith.negf %253 : vector<4x128xf32>
    %271 = math.exp %270 : vector<4x128xf32>
    %cst_220 = arith.constant 1.000000e+00 : f32
    %272 = vector.broadcast %cst_220 : f32 to vector<4x128xf32>
    %273 = arith.addf %272, %271 : vector<4x128xf32>
    %274 = arith.divf %272, %273 : vector<4x128xf32>
    %275 = arith.negf %259 : vector<4x128xf32>
    %276 = math.exp %275 : vector<4x128xf32>
    %cst_221 = arith.constant 1.000000e+00 : f32
    %277 = vector.broadcast %cst_221 : f32 to vector<4x128xf32>
    %278 = arith.addf %277, %276 : vector<4x128xf32>
    %279 = arith.divf %277, %278 : vector<4x128xf32>
    %c0_222 = arith.constant 0 : index
    %c0_223 = arith.constant 0 : index
    %c0_224 = arith.constant 0 : index
    %c0_225 = arith.constant 0 : index
    %280 = vector.load %arg2[%c0_222, %c0_223, %c0_224, %c0_225] : memref<1x8x4x128xf32, #tpu.memory_space<vmem>>, vector<1x1x4x128xf32>
    %281 = vector.shape_cast %280 : vector<1x1x4x128xf32> to vector<4x128xf32>
    %282 = arith.mulf %281, %281 : vector<4x128xf32>
    %283 = vector.broadcast %0 : f32 to vector<4x128xf32>
    %284 = arith.mulf %281, %283 : vector<4x128xf32>
    %285 = vector.broadcast %1 : f32 to vector<4x128xf32>
    %286 = arith.mulf %281, %285 : vector<4x128xf32>
    %287 = vector.broadcast %2 : f32 to vector<4x128xf32>
    %288 = arith.mulf %281, %287 : vector<4x128xf32>
    %289 = vector.broadcast %3 : f32 to vector<4x128xf32>
    %290 = arith.mulf %281, %289 : vector<4x128xf32>
    %c0_226 = arith.constant 0 : index
    %c1_227 = arith.constant 1 : index
    %c0_228 = arith.constant 0 : index
    %c0_229 = arith.constant 0 : index
    %291 = vector.load %arg2[%c0_226, %c1_227, %c0_228, %c0_229] : memref<1x8x4x128xf32, #tpu.memory_space<vmem>>, vector<1x1x4x128xf32>
    %292 = vector.shape_cast %291 : vector<1x1x4x128xf32> to vector<4x128xf32>
    %293 = arith.addf %281, %292 : vector<4x128xf32>
    %294 = arith.mulf %292, %292 : vector<4x128xf32>
    %295 = arith.addf %282, %294 : vector<4x128xf32>
    %296 = vector.broadcast %4 : f32 to vector<4x128xf32>
    %297 = arith.mulf %292, %296 : vector<4x128xf32>
    %298 = arith.addf %284, %297 : vector<4x128xf32>
    %299 = vector.broadcast %5 : f32 to vector<4x128xf32>
    %300 = arith.mulf %292, %299 : vector<4x128xf32>
    %301 = arith.addf %286, %300 : vector<4x128xf32>
    %302 = vector.broadcast %6 : f32 to vector<4x128xf32>
    %303 = arith.mulf %292, %302 : vector<4x128xf32>
    %304 = arith.addf %288, %303 : vector<4x128xf32>
    %305 = vector.broadcast %7 : f32 to vector<4x128xf32>
    %306 = arith.mulf %292, %305 : vector<4x128xf32>
    %307 = arith.addf %290, %306 : vector<4x128xf32>
    %c0_230 = arith.constant 0 : index
    %c2_231 = arith.constant 2 : index
    %c0_232 = arith.constant 0 : index
    %c0_233 = arith.constant 0 : index
    %308 = vector.load %arg2[%c0_230, %c2_231, %c0_232, %c0_233] : memref<1x8x4x128xf32, #tpu.memory_space<vmem>>, vector<1x1x4x128xf32>
    %309 = vector.shape_cast %308 : vector<1x1x4x128xf32> to vector<4x128xf32>
    %310 = arith.addf %293, %309 : vector<4x128xf32>
    %311 = arith.mulf %309, %309 : vector<4x128xf32>
    %312 = arith.addf %295, %311 : vector<4x128xf32>
    %313 = vector.broadcast %8 : f32 to vector<4x128xf32>
    %314 = arith.mulf %309, %313 : vector<4x128xf32>
    %315 = arith.addf %298, %314 : vector<4x128xf32>
    %316 = vector.broadcast %9 : f32 to vector<4x128xf32>
    %317 = arith.mulf %309, %316 : vector<4x128xf32>
    %318 = arith.addf %301, %317 : vector<4x128xf32>
    %319 = vector.broadcast %10 : f32 to vector<4x128xf32>
    %320 = arith.mulf %309, %319 : vector<4x128xf32>
    %321 = arith.addf %304, %320 : vector<4x128xf32>
    %322 = vector.broadcast %11 : f32 to vector<4x128xf32>
    %323 = arith.mulf %309, %322 : vector<4x128xf32>
    %324 = arith.addf %307, %323 : vector<4x128xf32>
    %c0_234 = arith.constant 0 : index
    %c3_235 = arith.constant 3 : index
    %c0_236 = arith.constant 0 : index
    %c0_237 = arith.constant 0 : index
    %325 = vector.load %arg2[%c0_234, %c3_235, %c0_236, %c0_237] : memref<1x8x4x128xf32, #tpu.memory_space<vmem>>, vector<1x1x4x128xf32>
    %326 = vector.shape_cast %325 : vector<1x1x4x128xf32> to vector<4x128xf32>
    %327 = arith.addf %310, %326 : vector<4x128xf32>
    %328 = arith.mulf %326, %326 : vector<4x128xf32>
    %329 = arith.addf %312, %328 : vector<4x128xf32>
    %330 = vector.broadcast %12 : f32 to vector<4x128xf32>
    %331 = arith.mulf %326, %330 : vector<4x128xf32>
    %332 = arith.addf %315, %331 : vector<4x128xf32>
    %333 = vector.broadcast %13 : f32 to vector<4x128xf32>
    %334 = arith.mulf %326, %333 : vector<4x128xf32>
    %335 = arith.addf %318, %334 : vector<4x128xf32>
    %336 = vector.broadcast %14 : f32 to vector<4x128xf32>
    %337 = arith.mulf %326, %336 : vector<4x128xf32>
    %338 = arith.addf %321, %337 : vector<4x128xf32>
    %339 = vector.broadcast %15 : f32 to vector<4x128xf32>
    %340 = arith.mulf %326, %339 : vector<4x128xf32>
    %341 = arith.addf %324, %340 : vector<4x128xf32>
    %c0_238 = arith.constant 0 : index
    %c4_239 = arith.constant 4 : index
    %c0_240 = arith.constant 0 : index
    %c0_241 = arith.constant 0 : index
    %342 = vector.load %arg2[%c0_238, %c4_239, %c0_240, %c0_241] : memref<1x8x4x128xf32, #tpu.memory_space<vmem>>, vector<1x1x4x128xf32>
    %343 = vector.shape_cast %342 : vector<1x1x4x128xf32> to vector<4x128xf32>
    %344 = arith.addf %327, %343 : vector<4x128xf32>
    %345 = arith.mulf %343, %343 : vector<4x128xf32>
    %346 = arith.addf %329, %345 : vector<4x128xf32>
    %347 = vector.broadcast %16 : f32 to vector<4x128xf32>
    %348 = arith.mulf %343, %347 : vector<4x128xf32>
    %349 = arith.addf %332, %348 : vector<4x128xf32>
    %350 = vector.broadcast %17 : f32 to vector<4x128xf32>
    %351 = arith.mulf %343, %350 : vector<4x128xf32>
    %352 = arith.addf %335, %351 : vector<4x128xf32>
    %353 = vector.broadcast %18 : f32 to vector<4x128xf32>
    %354 = arith.mulf %343, %353 : vector<4x128xf32>
    %355 = arith.addf %338, %354 : vector<4x128xf32>
    %356 = vector.broadcast %19 : f32 to vector<4x128xf32>
    %357 = arith.mulf %343, %356 : vector<4x128xf32>
    %358 = arith.addf %341, %357 : vector<4x128xf32>
    %c0_242 = arith.constant 0 : index
    %c5_243 = arith.constant 5 : index
    %c0_244 = arith.constant 0 : index
    %c0_245 = arith.constant 0 : index
    %359 = vector.load %arg2[%c0_242, %c5_243, %c0_244, %c0_245] : memref<1x8x4x128xf32, #tpu.memory_space<vmem>>, vector<1x1x4x128xf32>
    %360 = vector.shape_cast %359 : vector<1x1x4x128xf32> to vector<4x128xf32>
    %361 = arith.addf %344, %360 : vector<4x128xf32>
    %362 = arith.mulf %360, %360 : vector<4x128xf32>
    %363 = arith.addf %346, %362 : vector<4x128xf32>
    %364 = vector.broadcast %20 : f32 to vector<4x128xf32>
    %365 = arith.mulf %360, %364 : vector<4x128xf32>
    %366 = arith.addf %349, %365 : vector<4x128xf32>
    %367 = vector.broadcast %21 : f32 to vector<4x128xf32>
    %368 = arith.mulf %360, %367 : vector<4x128xf32>
    %369 = arith.addf %352, %368 : vector<4x128xf32>
    %370 = vector.broadcast %22 : f32 to vector<4x128xf32>
    %371 = arith.mulf %360, %370 : vector<4x128xf32>
    %372 = arith.addf %355, %371 : vector<4x128xf32>
    %373 = vector.broadcast %23 : f32 to vector<4x128xf32>
    %374 = arith.mulf %360, %373 : vector<4x128xf32>
    %375 = arith.addf %358, %374 : vector<4x128xf32>
    %c0_246 = arith.constant 0 : index
    %c6_247 = arith.constant 6 : index
    %c0_248 = arith.constant 0 : index
    %c0_249 = arith.constant 0 : index
    %376 = vector.load %arg2[%c0_246, %c6_247, %c0_248, %c0_249] : memref<1x8x4x128xf32, #tpu.memory_space<vmem>>, vector<1x1x4x128xf32>
    %377 = vector.shape_cast %376 : vector<1x1x4x128xf32> to vector<4x128xf32>
    %378 = arith.addf %361, %377 : vector<4x128xf32>
    %379 = arith.mulf %377, %377 : vector<4x128xf32>
    %380 = arith.addf %363, %379 : vector<4x128xf32>
    %381 = vector.broadcast %24 : f32 to vector<4x128xf32>
    %382 = arith.mulf %377, %381 : vector<4x128xf32>
    %383 = arith.addf %366, %382 : vector<4x128xf32>
    %384 = vector.broadcast %25 : f32 to vector<4x128xf32>
    %385 = arith.mulf %377, %384 : vector<4x128xf32>
    %386 = arith.addf %369, %385 : vector<4x128xf32>
    %387 = vector.broadcast %26 : f32 to vector<4x128xf32>
    %388 = arith.mulf %377, %387 : vector<4x128xf32>
    %389 = arith.addf %372, %388 : vector<4x128xf32>
    %390 = vector.broadcast %27 : f32 to vector<4x128xf32>
    %391 = arith.mulf %377, %390 : vector<4x128xf32>
    %392 = arith.addf %375, %391 : vector<4x128xf32>
    %c0_250 = arith.constant 0 : index
    %c7_251 = arith.constant 7 : index
    %c0_252 = arith.constant 0 : index
    %c0_253 = arith.constant 0 : index
    %393 = vector.load %arg2[%c0_250, %c7_251, %c0_252, %c0_253] : memref<1x8x4x128xf32, #tpu.memory_space<vmem>>, vector<1x1x4x128xf32>
    %394 = vector.shape_cast %393 : vector<1x1x4x128xf32> to vector<4x128xf32>
    %395 = arith.addf %378, %394 : vector<4x128xf32>
    %396 = arith.mulf %394, %394 : vector<4x128xf32>
    %397 = arith.addf %380, %396 : vector<4x128xf32>
    %398 = vector.broadcast %28 : f32 to vector<4x128xf32>
    %399 = arith.mulf %394, %398 : vector<4x128xf32>
    %400 = arith.addf %383, %399 : vector<4x128xf32>
    %401 = vector.broadcast %29 : f32 to vector<4x128xf32>
    %402 = arith.mulf %394, %401 : vector<4x128xf32>
    %403 = arith.addf %386, %402 : vector<4x128xf32>
    %404 = vector.broadcast %30 : f32 to vector<4x128xf32>
    %405 = arith.mulf %394, %404 : vector<4x128xf32>
    %406 = arith.addf %389, %405 : vector<4x128xf32>
    %407 = vector.broadcast %31 : f32 to vector<4x128xf32>
    %408 = arith.mulf %394, %407 : vector<4x128xf32>
    %409 = arith.addf %392, %408 : vector<4x128xf32>
    %cst_254 = arith.constant 1.250000e-01 : f32
    %410 = vector.broadcast %cst_254 : f32 to vector<4x128xf32>
    %411 = arith.mulf %395, %410 : vector<4x128xf32>
    %cst_255 = arith.constant 1.250000e-01 : f32
    %412 = vector.broadcast %cst_255 : f32 to vector<4x128xf32>
    %413 = arith.mulf %397, %412 : vector<4x128xf32>
    %414 = arith.mulf %411, %411 : vector<4x128xf32>
    %415 = arith.subf %413, %414 : vector<4x128xf32>
    %cst_256 = arith.constant 9.99999974E-6 : f32
    %416 = vector.broadcast %cst_256 : f32 to vector<4x128xf32>
    %417 = arith.addf %415, %416 : vector<4x128xf32>
    %418 = math.rsqrt %417 : vector<4x128xf32>
    %419 = arith.mulf %411, %418 : vector<4x128xf32>
    %420 = arith.mulf %400, %418 : vector<4x128xf32>
    %421 = vector.broadcast %88 : f32 to vector<4x128xf32>
    %422 = arith.mulf %419, %421 : vector<4x128xf32>
    %423 = arith.subf %420, %422 : vector<4x128xf32>
    %424 = vector.broadcast %80 : f32 to vector<4x128xf32>
    %425 = arith.addf %423, %424 : vector<4x128xf32>
    %426 = arith.mulf %403, %418 : vector<4x128xf32>
    %427 = vector.broadcast %89 : f32 to vector<4x128xf32>
    %428 = arith.mulf %419, %427 : vector<4x128xf32>
    %429 = arith.subf %426, %428 : vector<4x128xf32>
    %430 = vector.broadcast %81 : f32 to vector<4x128xf32>
    %431 = arith.addf %429, %430 : vector<4x128xf32>
    %432 = arith.mulf %406, %418 : vector<4x128xf32>
    %433 = vector.broadcast %90 : f32 to vector<4x128xf32>
    %434 = arith.mulf %419, %433 : vector<4x128xf32>
    %435 = arith.subf %432, %434 : vector<4x128xf32>
    %436 = vector.broadcast %82 : f32 to vector<4x128xf32>
    %437 = arith.addf %435, %436 : vector<4x128xf32>
    %438 = arith.mulf %409, %418 : vector<4x128xf32>
    %439 = vector.broadcast %91 : f32 to vector<4x128xf32>
    %440 = arith.mulf %419, %439 : vector<4x128xf32>
    %441 = arith.subf %438, %440 : vector<4x128xf32>
    %442 = vector.broadcast %83 : f32 to vector<4x128xf32>
    %443 = arith.addf %441, %442 : vector<4x128xf32>
    %cst_257 = arith.constant 5.000000e-01 : f32
    %444 = vector.broadcast %cst_257 : f32 to vector<4x128xf32>
    %445 = arith.mulf %444, %425 : vector<4x128xf32>
    %cst_258 = arith.constant 0.707106769 : f32
    %446 = vector.broadcast %cst_258 : f32 to vector<4x128xf32>
    %447 = arith.mulf %425, %446 : vector<4x128xf32>
    %448 = math.erf %447 : vector<4x128xf32>
    %cst_259 = arith.constant 1.000000e+00 : f32
    %449 = vector.broadcast %cst_259 : f32 to vector<4x128xf32>
    %450 = arith.addf %449, %448 : vector<4x128xf32>
    %451 = arith.mulf %445, %450 : vector<4x128xf32>
    %452 = arith.mulf %451, %264 : vector<4x128xf32>
    %cst_260 = arith.constant 5.000000e-01 : f32
    %453 = vector.broadcast %cst_260 : f32 to vector<4x128xf32>
    %454 = arith.mulf %453, %431 : vector<4x128xf32>
    %cst_261 = arith.constant 0.707106769 : f32
    %455 = vector.broadcast %cst_261 : f32 to vector<4x128xf32>
    %456 = arith.mulf %431, %455 : vector<4x128xf32>
    %457 = math.erf %456 : vector<4x128xf32>
    %cst_262 = arith.constant 1.000000e+00 : f32
    %458 = vector.broadcast %cst_262 : f32 to vector<4x128xf32>
    %459 = arith.addf %458, %457 : vector<4x128xf32>
    %460 = arith.mulf %454, %459 : vector<4x128xf32>
    %461 = arith.mulf %460, %269 : vector<4x128xf32>
    %cst_263 = arith.constant 5.000000e-01 : f32
    %462 = vector.broadcast %cst_263 : f32 to vector<4x128xf32>
    %463 = arith.mulf %462, %437 : vector<4x128xf32>
    %cst_264 = arith.constant 0.707106769 : f32
    %464 = vector.broadcast %cst_264 : f32 to vector<4x128xf32>
    %465 = arith.mulf %437, %464 : vector<4x128xf32>
    %466 = math.erf %465 : vector<4x128xf32>
    %cst_265 = arith.constant 1.000000e+00 : f32
    %467 = vector.broadcast %cst_265 : f32 to vector<4x128xf32>
    %468 = arith.addf %467, %466 : vector<4x128xf32>
    %469 = arith.mulf %463, %468 : vector<4x128xf32>
    %470 = arith.mulf %469, %274 : vector<4x128xf32>
    %cst_266 = arith.constant 5.000000e-01 : f32
    %471 = vector.broadcast %cst_266 : f32 to vector<4x128xf32>
    %472 = arith.mulf %471, %443 : vector<4x128xf32>
    %cst_267 = arith.constant 0.707106769 : f32
    %473 = vector.broadcast %cst_267 : f32 to vector<4x128xf32>
    %474 = arith.mulf %443, %473 : vector<4x128xf32>
    %475 = math.erf %474 : vector<4x128xf32>
    %cst_268 = arith.constant 1.000000e+00 : f32
    %476 = vector.broadcast %cst_268 : f32 to vector<4x128xf32>
    %477 = arith.addf %476, %475 : vector<4x128xf32>
    %478 = arith.mulf %472, %477 : vector<4x128xf32>
    %479 = arith.mulf %478, %279 : vector<4x128xf32>
    %480 = vector.broadcast %64 : f32 to vector<4x128xf32>
    %481 = arith.mulf %452, %480 : vector<4x128xf32>
    %482 = vector.broadcast %68 : f32 to vector<4x128xf32>
    %483 = arith.mulf %461, %482 : vector<4x128xf32>
    %484 = arith.addf %481, %483 : vector<4x128xf32>
    %485 = vector.broadcast %72 : f32 to vector<4x128xf32>
    %486 = arith.mulf %470, %485 : vector<4x128xf32>
    %487 = arith.addf %484, %486 : vector<4x128xf32>
    %488 = vector.broadcast %76 : f32 to vector<4x128xf32>
    %489 = arith.mulf %479, %488 : vector<4x128xf32>
    %490 = arith.addf %487, %489 : vector<4x128xf32>
    %c0_269 = arith.constant 0 : index
    %c0_270 = arith.constant 0 : index
    %c0_271 = arith.constant 0 : index
    %c0_272 = arith.constant 0 : index
    %491 = vector.load %arg12[%c0_269, %c0_270, %c0_271, %c0_272] : memref<1x4x4x128xf32, #tpu.memory_space<vmem>>, vector<1x1x4x128xf32>
    %492 = vector.shape_cast %491 : vector<1x1x4x128xf32> to vector<4x128xf32>
    %493 = vector.shape_cast %490 : vector<4x128xf32> to vector<1x1x4x128xf32>
    tpu.vector_store %arg12[%c0_269, %c0_270, %c0_271, %c0_272], %493 {strides = array<i32>} : memref<1x4x4x128xf32, #tpu.memory_space<vmem>>, vector<1x1x4x128xf32>,
    %494 = vector.broadcast %65 : f32 to vector<4x128xf32>
    %495 = arith.mulf %452, %494 : vector<4x128xf32>
    %496 = vector.broadcast %69 : f32 to vector<4x128xf32>
    %497 = arith.mulf %461, %496 : vector<4x128xf32>
    %498 = arith.addf %495, %497 : vector<4x128xf32>
    %499 = vector.broadcast %73 : f32 to vector<4x128xf32>
    %500 = arith.mulf %470, %499 : vector<4x128xf32>
    %501 = arith.addf %498, %500 : vector<4x128xf32>
    %502 = vector.broadcast %77 : f32 to vector<4x128xf32>
    %503 = arith.mulf %479, %502 : vector<4x128xf32>
    %504 = arith.addf %501, %503 : vector<4x128xf32>
    %c0_273 = arith.constant 0 : index
    %c1_274 = arith.constant 1 : index
    %c0_275 = arith.constant 0 : index
    %c0_276 = arith.constant 0 : index
    %505 = vector.load %arg12[%c0_273, %c1_274, %c0_275, %c0_276] : memref<1x4x4x128xf32, #tpu.memory_space<vmem>>, vector<1x1x4x128xf32>
    %506 = vector.shape_cast %505 : vector<1x1x4x128xf32> to vector<4x128xf32>
    %507 = vector.shape_cast %504 : vector<4x128xf32> to vector<1x1x4x128xf32>
    tpu.vector_store %arg12[%c0_273, %c1_274, %c0_275, %c0_276], %507 {strides = array<i32>} : memref<1x4x4x128xf32, #tpu.memory_space<vmem>>, vector<1x1x4x128xf32>,
    %508 = vector.broadcast %66 : f32 to vector<4x128xf32>
    %509 = arith.mulf %452, %508 : vector<4x128xf32>
    %510 = vector.broadcast %70 : f32 to vector<4x128xf32>
    %511 = arith.mulf %461, %510 : vector<4x128xf32>
    %512 = arith.addf %509, %511 : vector<4x128xf32>
    %513 = vector.broadcast %74 : f32 to vector<4x128xf32>
    %514 = arith.mulf %470, %513 : vector<4x128xf32>
    %515 = arith.addf %512, %514 : vector<4x128xf32>
    %516 = vector.broadcast %78 : f32 to vector<4x128xf32>
    %517 = arith.mulf %479, %516 : vector<4x128xf32>
    %518 = arith.addf %515, %517 : vector<4x128xf32>
    %c0_277 = arith.constant 0 : index
    %c2_278 = arith.constant 2 : index
    %c0_279 = arith.constant 0 : index
    %c0_280 = arith.constant 0 : index
    %519 = vector.load %arg12[%c0_277, %c2_278, %c0_279, %c0_280] : memref<1x4x4x128xf32, #tpu.memory_space<vmem>>, vector<1x1x4x128xf32>
    %520 = vector.shape_cast %519 : vector<1x1x4x128xf32> to vector<4x128xf32>
    %521 = vector.shape_cast %518 : vector<4x128xf32> to vector<1x1x4x128xf32>
    tpu.vector_store %arg12[%c0_277, %c2_278, %c0_279, %c0_280], %521 {strides = array<i32>} : memref<1x4x4x128xf32, #tpu.memory_space<vmem>>, vector<1x1x4x128xf32>,
    %522 = vector.broadcast %67 : f32 to vector<4x128xf32>
    %523 = arith.mulf %452, %522 : vector<4x128xf32>
    %524 = vector.broadcast %71 : f32 to vector<4x128xf32>
    %525 = arith.mulf %461, %524 : vector<4x128xf32>
    %526 = arith.addf %523, %525 : vector<4x128xf32>
    %527 = vector.broadcast %75 : f32 to vector<4x128xf32>
    %528 = arith.mulf %470, %527 : vector<4x128xf32>
    %529 = arith.addf %526, %528 : vector<4x128xf32>
    %530 = vector.broadcast %79 : f32 to vector<4x128xf32>
    %531 = arith.mulf %479, %530 : vector<4x128xf32>
    %532 = arith.addf %529, %531 : vector<4x128xf32>
    %c0_281 = arith.constant 0 : index
    %c3_282 = arith.constant 3 : index
    %c0_283 = arith.constant 0 : index
    %c0_284 = arith.constant 0 : index
    %533 = vector.load %arg12[%c0_281, %c3_282, %c0_283, %c0_284] : memref<1x4x4x128xf32, #tpu.memory_space<vmem>>, vector<1x1x4x128xf32>
    %534 = vector.shape_cast %533 : vector<1x1x4x128xf32> to vector<4x128xf32>
    %535 = vector.shape_cast %532 : vector<4x128xf32> to vector<1x1x4x128xf32>
    tpu.vector_store %arg12[%c0_281, %c3_282, %c0_283, %c0_284], %535 {strides = array<i32>} : memref<1x4x4x128xf32, #tpu.memory_space<vmem>>, vector<1x1x4x128xf32>,
    return
  }
  func.func @transform_0(%arg0: i32, %arg1: i32) -> (i32, i32, i32, i32) {
    %c0_i32 = arith.constant 0 : i32
    %c0_i32_0 = arith.constant 0 : i32
    %c0_i32_1 = arith.constant 0 : i32
    return %arg1, %c0_i32, %arg0, %c0_i32_0 : i32, i32, i32, i32
  }
  func.func @transform_1(%arg0: i32, %arg1: i32) -> (i32, i32, i32, i32) {
    %c0_i32 = arith.constant 0 : i32
    %c0_i32_0 = arith.constant 0 : i32
    %c0_i32_1 = arith.constant 0 : i32
    return %arg1, %c0_i32, %arg0, %c0_i32_0 : i32, i32, i32, i32
  }
  func.func @transform_2(%arg0: i32, %arg1: i32) -> (i32, i32, i32, i32) {
    %c0_i32 = arith.constant 0 : i32
    %c0_i32_0 = arith.constant 0 : i32
    %c0_i32_1 = arith.constant 0 : i32
    return %arg1, %c0_i32, %arg0, %c0_i32_0 : i32, i32, i32, i32
  }
  func.func @transform_3(%arg0: i32, %arg1: i32) -> (i32, i32) {
    %c0_i32 = arith.constant 0 : i32
    %c0_i32_0 = arith.constant 0 : i32
    %c0_i32_1 = arith.constant 0 : i32
    return %c0_i32, %c0_i32_0 : i32, i32
  }
  func.func @transform_4(%arg0: i32, %arg1: i32) -> (i32, i32) {
    %c0_i32 = arith.constant 0 : i32
    %c0_i32_0 = arith.constant 0 : i32
    %c0_i32_1 = arith.constant 0 : i32
    return %c0_i32, %c0_i32_0 : i32, i32
  }
  func.func @transform_5(%arg0: i32, %arg1: i32) -> (i32, i32) {
    %c0_i32 = arith.constant 0 : i32
    %c0_i32_0 = arith.constant 0 : i32
    %c0_i32_1 = arith.constant 0 : i32
    return %c0_i32, %c0_i32_0 : i32, i32
  }
  func.func @transform_6(%arg0: i32, %arg1: i32) -> (i32, i32) {
    %c0_i32 = arith.constant 0 : i32
    %c0_i32_0 = arith.constant 0 : i32
    %c0_i32_1 = arith.constant 0 : i32
    return %c0_i32, %c0_i32_0 : i32, i32
  }
  func.func @transform_7(%arg0: i32, %arg1: i32) -> (i32, i32) {
    %c0_i32 = arith.constant 0 : i32
    %c0_i32_0 = arith.constant 0 : i32
    %c0_i32_1 = arith.constant 0 : i32
    return %c0_i32, %c0_i32_0 : i32, i32
  }
  func.func @transform_8(%arg0: i32, %arg1: i32) -> (i32, i32) {
    %c0_i32 = arith.constant 0 : i32
    %c0_i32_0 = arith.constant 0 : i32
    %c0_i32_1 = arith.constant 0 : i32
    return %c0_i32, %c0_i32_0 : i32, i32
  }
  func.func @transform_9(%arg0: i32, %arg1: i32) -> (i32, i32) {
    %c0_i32 = arith.constant 0 : i32
    %c0_i32_0 = arith.constant 0 : i32
    %c0_i32_1 = arith.constant 0 : i32
    return %c0_i32, %c0_i32_0 : i32, i32
  }
  func.func @transform_10(%arg0: i32, %arg1: i32) -> (i32, i32, i32, i32) {
    %c0_i32 = arith.constant 0 : i32
    %c0_i32_0 = arith.constant 0 : i32
    %c0_i32_1 = arith.constant 0 : i32
    return %arg1, %c0_i32, %arg0, %c0_i32_0 : i32, i32, i32, i32
  }
}

</mosaic_0001>

<bundles_post_ra>
// kernel: tpu_custom_call.1
= control target key start
LH: loop header
LB: loop body
LE: loop exit
PB: predicated region body
PF: predicated region fallthrough
CT: control target
= control target key end

     0   :  { %s2834_s0 = inlined_call_operand.hbm [shape: f32[2,8,4,128], index: 0, kind: input, shape index: {}]   ;;  %s2835_s1 = inlined_call_operand.hbm [shape: f32[2,4,4,128], index: 1, kind: input, shape index: {}]   ;;  %s2836_s2 = inlined_call_operand.hbm [shape: f32[2,4,4,128], index: 2, kind: input, shape index: {}]   ;;  %s2837_s3 = inlined_call_operand.vmem [shape: f32[8,4], index: 3, kind: input, shape index: {}]   ;;  %s2838_s4 = inlined_call_operand.vmem [shape: f32[1,4], index: 4, kind: input, shape index: {}]   ;;  %s2839_s5 = inlined_call_operand.vmem [shape: f32[1,4], index: 5, kind: input, shape index: {}]   ;;  %s2840_s6 = inlined_call_operand.vmem [shape: f32[8,4], index: 6, kind: input, shape index: {}]   ;;  %s2841_s7 = inlined_call_operand.vmem [shape: f32[1,4], index: 7, kind: input, shape index: {}]   ;;  %s2842_s8 = inlined_call_operand.vmem [shape: f32[1,4], index: 8, kind: input, shape index: {}]   ;;  %s2843_s9 = inlined_call_operand.vmem [shape: f32[4,4], index: 9, kind: input, shape index: {}]   ;;  %s2844_s10 = inlined_call_operand.hbm [shape: f32[2,4,4,128], index: 10, kind: output, shape index: {}]  }
   0x1   :  { %2869 = sst [smem:[#allocation36_spill]] %s2835_s1 }
   0x2   :  { %2870 = sst [smem:[#allocation37_spill]] %s2838_s4 }
   0x3   :  { %2871 = sst [smem:[#allocation38_spill]] %s2840_s6 }
   0x4   :  { %2872 = sst [smem:[#allocation39_spill]] %s2842_s8 }
   0x5   :  { %2873 = sst [smem:[#allocation40_spill]] %s2844_s10 }
   0x6   :  { %15 = vsyncpa [#allocation3], 0 }
   0x7   :  { %17 = vsyncpa [#allocation3 + $0x1], 0 }
   0x8   :  { %18 = vsyncpa [#allocation7], 0 }
   0x9   :  { %20 = vsyncpa [#allocation7 + $0x1], 0 }
   0xa   :  { %21 = vsyncpa [#allocation5], 0 }
   0xb   :  { %22 = vsyncpa [#allocation11], 0 }
   0xc   :  { %23 = vsyncpa [#allocation14], 0 }
   0xd   :  { %24 = vsyncpa [#allocation17], 0 }
   0xe   :  { %25 = vsyncpa [#allocation4], 0 }
   0xf   :  { %27 = vsyncpa [#allocation4 + $0x1], 0  ;;  %s1991_s13 = smov 0   ;;  %s1993_s14 = smov 0  }
  0x10   :  { %s1995_s15 = smov 0   ;;  %s1997_s16 = smov 0  }
  0x11   :  { %s1999_s17 = smov 0   ;;  %s2001_s18 = smov 0  }
  0x12 LB: > { %2874 = sst [smem:[#allocation27_spill]] %s1899_s13  ;;  %s2878_s4 = sld [smem:[#allocation37_spill]]  ;;  %s1919_s18 = sphi %s2001_s18, %s33_s18   ;;  %s1915_s17 = sphi %s1999_s17, %s2927_s17   ;;  %s1911_s16 = sphi %s1997_s16, %s2926_s16   ;;  %s1907_s15 = sphi %s1995_s15, %s2922_s15   ;;  %s1903_s14 = sphi %s1993_s14, %s2925_s14   ;;  %s1899_s13 = sphi %s1991_s13, %s2924_s13  }
  0x13   : > { %2875 = sst [smem:[#allocation28_spill]] %s1907_s15  ;;  %s2025_s22 = sadd.s32 4294967295, %s1919_s18  }
  0x14   : > { %2876 = sst [smem:[#allocation29_spill]] %s1911_s16  ;;  %p1299_p0 = scmp.ge.s32.totalorder %s1919_s18, 1 }
  0x15   : > { %2877 = sst [smem:[#allocation30_spill]] %s1919_s18  ;;  %p2845_p1 = scmp.eq.s32.totalorder %s2025_s22, 0 }
  0x16   : > { %2879 = sst [smem:[#allocation31_spill]] %s2025_s22  ;;  %p309_p2 = scmp.lt.s32.totalorder %s1919_s18, 3 }
  0x17   : > { %s2881_s6 = sld [smem:[#allocation38_spill]]  ;;  %s2882_s8 = sld [smem:[#allocation39_spill]] }
  0x18   : > { %s333_s21 = sshll.u32 %s2878_s4, 4  ;;  %p2030_p3 = pnand %p1299_p0, %p309_p2  ;;  %s334_s21 = int_to_ptr.vmem [resolvable:$true] %s333_s21 }
  0x19   : > { %s1622_s11 = scalar_lea.vmem %s334_s21, 16  ;;  %p1630_p11 = scmp.lt.s32.totalorder %s334_s21, %s334_s21 }
  0x1a   : > { %s2880_s23 = scalar_select %p2030_p3, 1, 0 }
  0x1b   : > { %p1483_p5 = pneg %p2030_p3  ;;  %p1623_p7 = scmp.ne.s32.totalorder %s334_s21, %s1622_s11 }
  0x1c   : > { %p1631_p12 = scmp.lt.s32.totalorder %s1622_s11, %s1622_s11 }
  0x1d   : > { %s355_s26 = sshll.u32 %s2881_s6, 4  ;;  %s377_s29 = sshll.u32 %s2882_s8, 4  ;;  %s356_s26 = int_to_ptr.vmem [resolvable:$true] %s355_s26  ;;  %s2049_s29 = int_to_ptr.vmem [resolvable:$true] %s377_s29 }
  0x1e   : > { %p2045_p6 = pnand %p1483_p5, %p2845_p1  ;;  %p1632_p13 = por %p1631_p12, %p1630_p11 }
  0x20   : > { %s2883_s30 = scalar_select %p2045_p6, 1, 0 }
  0x21   : > { %p2053_p8 = pneg %p2045_p6 }
  0x23   : > { %s2884_s12 = scalar_select %p2053_p8, 1, 0 }
  0x24   : > { %p1625_p9 = pnand %p2053_p8, %p1623_p7 }
  0x26   : > { %p1626_p10 = pneg %p1625_p9 }
  0x28   : > { %p1633_p0 = pnand %p1632_p13, %p1626_p10 }
  0x2a   : > { %1636 = shalt.err (!%p1633_p0)
}
  0x2b   : > { %s1921_s19 = smov [#allocation10]   ;;  %s1637_s20 = scalar_lea.vmem %s356_s26, 128 }
  0x2c   : > { %1489 = dma.vmem_to_smem (!%p2045_p6), %s334_s21, 16, %s1921_s19, [#allocation11]  }
  0x2d   : > { %p1638_p2 = scmp.ne.s32.totalorder %s356_s26, %s1637_s20  ;;  %p1645_p1 = scmp.lt.s32.totalorder %s356_s26, %s356_s26 }
  0x2e   : > { %p1646_p3 = scmp.lt.s32.totalorder %s1637_s20, %s1637_s20 }
  0x2f   : > { %p1640_p5 = pnand %p1638_p2, %p2053_p8 }
  0x30   : > { %p1647_p7 = por %p1646_p3, %p1645_p1 }
  0x31   : > { %p1641_p4 = pneg %p1640_p5 }
  0x33   : > { %p1648_p9 = pnand %p1647_p7, %p1641_p4 }
  0x35   : > { %1651 = shalt.err (!%p1648_p9)
}
  0x36   : > { %s1922_s24 = smov [#allocation13]   ;;  %s1652_s25 = scalar_lea.vmem %s2049_s29, 16 }
  0x37   : > { %1495 = dma.vmem_to_smem (!%p2045_p6), %s356_s26, 128, %s1922_s24, [#allocation14]  }
  0x38   : > { %p1653_p10 = scmp.ne.s32.totalorder %s2049_s29, %s1652_s25  ;;  %p1660_p13 = scmp.lt.s32.totalorder %s2049_s29, %s2049_s29 }
  0x39   : > { %p1661_p0 = scmp.lt.s32.totalorder %s1652_s25, %s1652_s25 }
  0x3a   : > { %p1655_p11 = pnand %p1653_p10, %p2053_p8 }
  0x3b   : > { %p1662_p2 = por %p1661_p0, %p1660_p13 }
  0x3c   : > { %p1656_p12 = pneg %p1655_p11 }
  0x3e   : > { %p1663_p1 = pnand %p1662_p2, %p1656_p12 }
  0x40   : > { %1666 = shalt.err (!%p1663_p1)
}
  0x41   : > { %s1923_s21 = smov [#allocation16]   ;;  %s1298_s26 = sadd.s32 4294967294, %s1919_s18  }
  0x42   : > { %1501 = dma.vmem_to_smem (!%p2045_p6), %s2049_s29, 16, %s1923_s21, [#allocation17]  }
  0x43   : > { %s42_s27 = sadd.s32 1, %s1915_s17  ;;  %s54_s28 = sadd.s32 1, %s1907_s15 }
  0x44   : > { %p43_p3 = scmp.ge.s32.totalorder %s42_s27, 2  ;;  %p61_p4 = scmp.ne.s32.totalorder %s1907_s15, %s1903_s14 }
  0x45   : > { %p62_p5 = scmp.eq.s32.totalorder %s1919_s18, 0  ;;  %p67_p7 = scmp.ne.s32.totalorder %s1903_s14, %s1899_s13 }
  0x46   : > { %s2929_s27 = smov (%p43_p3, %s42_s27), 0  ;;  %p2886_p10 = scmp.eq.s32.totalorder %s2025_s22, 0 }
  0x47   : > { %2885 = sst [smem:[#allocation32_spill]] %s2929_s27  ;;  %p63_p9 = por %p62_p5, %p61_p4 }
  0x48   : > { %p2086_p11 = por %p2886_p10, %p67_p7  ;;  %s49_s29 = ssub.s32 %s1915_s17, %s2929_s27 }
  0x49   : > { %p296_p12 = scmp.eq.s32.totalorder %s2025_s22, 1  ;;  %p52_p13 = scmp.eq.s32.totalorder %s49_s29, 0 }
  0x4a   : > { %s2887_s11 = scalar_select %p2086_p11, 1, 0 }
  0x4b   : > { %p302_p0 = scmp.eq.s32.totalorder %s1298_s26, 1  ;;  %p2093_p2 = por %p296_p12, %p61_p4 }
  0x4c   : > { %p1526_p1 = scmp.lt.s32.totalorder %s1919_s18, 2  ;;  %s2106_s25 = sand.u32 1, %s1907_s15  }
  0x4d   : > { %s2888_s19 = scalar_select %p2093_p2, 1, 0 }
  0x4e   : > { %s2099_s20 = scalar_select %p52_p13, %s1907_s15, %s54_s28  }
  0x4f   : > { %2889 = sst [smem:[#allocation33_spill]] %s2888_s19  ;;  %p2101_p3 = por %p302_p0, %p67_p7 }
  0x50   : > { %2890 = sst [smem:[#allocation34_spill]] %s2099_s20  ;;  %p2108_p5 = pnand %p1526_p1, %p63_p9 }
  0x51   : > { %s2891_s24 = scalar_select %p2101_p3, 1, 0 }
  0x52   : > { %s2893_s21 = scalar_select %p2108_p5, 1, 0 }
  0x53   : > { %2892 = sst [smem:[#allocation35_spill]] %s2891_s24  ;;  %s421_s26 = sand.u32 1, %s1919_s18  }
  0x54   : > { %s2854_s29 = sshll.u32 %s2106_s25, 4  ;;  %s1444_s4 = sshll.u32 %s1915_s17, 8 }
  0x55   : > { %s2894_s1 = sld [smem:[#allocation36_spill]]  ;;  %s425_s27 = scalar_lea.vmem [#allocation6], %s2854_s29 }
  0x56   : > { %s433_s20 = sshll.u32 %s425_s27, 4  ;;  %s2127_s18 = scalar_lea.hbm %s2836_s2, %s1444_s4  ;;  %s2122_s20 = int_to_ptr.vmem [resolvable:$true] %s433_s20 }
  0x57   : > { %s2129_s13 = scalar_lea.sflag [#allocation7], %s421_s26  ;;  %p2135_p7 = pneg %p2108_p5 }
  0x59   : > { %s2895_s6 = scalar_select %p2135_p7, 1, 0 }
  0x5b   : > { %s2118_s28 = scalar_lea.hbm %s2894_s1, %s1444_s4  ;;  %s1672_s29 = scalar_lea.hbm %s2894_s1, 512 }
  0x5c   : > { %s1667_s10 = scalar_lea.hbm %s2118_s28, 256  ;;  %p1673_p12 = scmp.lt.u32.totalorder %s2118_s28, %s2894_s1 }
  0x5d   : > { %p1668_p4 = scmp.ne.s32.totalorder %s2118_s28, %s1667_s10  ;;  %p1674_p13 = scmp.lt.u32.totalorder %s1672_s29, %s1667_s10 }
  0x5e   : > { %p1676_p1 = scmp.lt.u32.totalorder %s1667_s10, %s2118_s28 }
  0x5f   : > { %p1670_p9 = pnand %p2135_p7, %p1668_p4  ;;  %p1675_p0 = por %p1674_p13, %p1673_p12 }
  0x61   : > { %p1671_p10 = pneg %p1670_p9  ;;  %p1677_p3 = por %p1676_p1, %p1675_p0 }
  0x63   : > { %p1678_p2 = pnand %p1677_p3, %p1671_p10 }
  0x65   : > { %1681 = shalt.err (!%p1678_p2)
}
  0x66   : > { %s1682_s24 = scalar_lea.vmem %s2122_s20, 256  ;;  %s1924_s26 = smov [#allocation6]  }
  0x67   : > { %p1683_p4 = scmp.ne.s32.totalorder %s2122_s20, %s1682_s24  ;;  %s1687_s8 = sshll.u32 %s1924_s26, 4  ;;  %s1688_s8 = int_to_ptr.vmem [resolvable:$false] %s1687_s8 }
  0x68   : > { %s1689_s27 = scalar_lea.vmem %s1688_s8, 512  ;;  %p1690_p6 = scmp.lt.s32.totalorder %s2122_s20, %s1688_s8 }
  0x69   : > { %p1685_p9 = pnand %p1683_p4, %p2135_p7  ;;  %p1691_p8 = scmp.lt.s32.totalorder %s1689_s27, %s1682_s24 }
  0x6b   : > { %p1686_p11 = pneg %p1685_p9  ;;  %p1692_p12 = por %p1691_p8, %p1690_p6 }
  0x6d   : > { %p1693_p13 = pnand %p1692_p12, %p1686_p11 }
  0x6f   : > { %1696 = shalt.err (!%p1693_p13)
}
  0x70   : > { %s1925_s10 = smov 64   ;;  %s1926_s29 = smov 4  }
  0x71   : > { %1511 = dma.hbm_to_vmem [thread:$0]  (!%p2108_p5), %s2118_s28, 256, %s2122_s20, %s2129_s13, %s1925_s10, %s1925_s10, %s1926_s29  }
  0x72   : > { %s2896_s15 = sshll.u32 %s2106_s25, 4  ;;  %s322_s27 = sshll.u32 %s2837_s3, 4  ;;  %s323_s27 = int_to_ptr.vmem [resolvable:$true] %s322_s27 }
  0x73   : > { %s447_s4 = scalar_lea.vmem [#allocation8], %s2896_s15  ;;  %s344_s16 = sshll.u32 %s2839_s5, 4  ;;  %s345_s16 = int_to_ptr.vmem [resolvable:$true] %s344_s16 }
  0x74   : > { %s455_s26 = sshll.u32 %s447_s4, 4  ;;  %s1697_s22 = scalar_lea.vmem %s323_s27, 128  ;;  %s2164_s26 = int_to_ptr.vmem [resolvable:$true] %s455_s26 }
  0x75   : > { %p1698_p6 = scmp.ne.s32.totalorder %s323_s27, %s1697_s22  ;;  %p2897_p8 = scmp.ne.s32.totalorder %s2884_s12, 0 }
  0x76   : > { %p1705_p3 = scmp.lt.s32.totalorder %s323_s27, %s323_s27  ;;  %p1706_p10 = scmp.lt.s32.totalorder %s1697_s22, %s1697_s22 }
  0x77   : > { %p1700_p11 = pnand %p1698_p6, %p2897_p8 }
  0x78   : > { %p1707_p0 = por %p1706_p10, %p1705_p3 }
  0x79   : > { %p1701_p2 = pneg %p1700_p11 }
  0x7b   : > { %p1708_p1 = pnand %p1707_p0, %p1701_p2 }
  0x7d   : > { %1711 = shalt.err (!%p1708_p1)
}
  0x7e   : > { %s1927_s20 = smov [#allocation9]   ;;  %p2898_p4 = scmp.ne.s32.totalorder %s2883_s30, 0 }
  0x7f   : > { %s1712_s28 = scalar_lea.vmem %s345_s16, 16  ;;  %p1720_p5 = scmp.lt.s32.totalorder %s345_s16, %s345_s16 }
  0x80   : > { %1486 = dma.vmem_to_smem (!%p2898_p4), %s323_s27, 128, %s1927_s20, [#allocation5]  }
  0x81   : > { %p1713_p9 = scmp.ne.s32.totalorder %s345_s16, %s1712_s28  ;;  %p1721_p7 = scmp.lt.s32.totalorder %s1712_s28, %s1712_s28 }
  0x83   : > { %p1715_p12 = pnand %p1713_p9, %p2897_p8  ;;  %p1722_p6 = por %p1721_p7, %p1720_p5 }
  0x85   : > { %p1716_p13 = pneg %p1715_p12 }
  0x87   : > { %p1723_p11 = pnand %p1722_p6, %p1716_p13 }
  0x89   : > { %1726 = shalt.err (!%p1723_p11)
}
  0x8a   : > { %s1928_s1 = smov [#allocation12]   ;;  %s366_s15 = sshll.u32 %s2841_s7, 4  ;;  %s367_s15 = int_to_ptr.vmem [resolvable:$true] %s366_s15 }
  0x8b   : > { %1492 = dma.vmem_to_smem (!%p2898_p4), %s345_s16, 16, %s1928_s1, [#allocation11]  }
  0x8c   : > { %s388_s8 = sshll.u32 %s2843_s9, 4  ;;  %s1727_s27 = scalar_lea.vmem %s367_s15, 16  ;;  %s389_s8 = int_to_ptr.vmem [resolvable:$true] %s388_s8 }
  0x8d   : > { %p1728_p2 = scmp.ne.s32.totalorder %s367_s15, %s1727_s27  ;;  %p1735_p3 = scmp.lt.s32.totalorder %s367_s15, %s367_s15 }
  0x8e   : > { %p1736_p10 = scmp.lt.s32.totalorder %s1727_s27, %s1727_s27 }
  0x8f   : > { %p1730_p5 = pnand %p1728_p2, %p2897_p8 }
  0x90   : > { %p1737_p0 = por %p1736_p10, %p1735_p3 }
  0x91   : > { %p1731_p7 = pneg %p1730_p5 }
  0x93   : > { %p1738_p1 = pnand %p1737_p0, %p1731_p7 }
  0x95   : > { %1741 = shalt.err (!%p1738_p1)
}
  0x96   : > { %s1929_s16 = smov [#allocation15]   ;;  %s1742_s20 = scalar_lea.vmem %s389_s8, 64 }
  0x97   : > { %1498 = dma.vmem_to_smem (!%p2898_p4), %s367_s15, 16, %s1929_s16, [#allocation14]  }
  0x98   : > { %p1743_p9 = scmp.ne.s32.totalorder %s389_s8, %s1742_s20  ;;  %p1750_p6 = scmp.lt.s32.totalorder %s389_s8, %s389_s8 }
  0x99   : > { %p1751_p11 = scmp.lt.s32.totalorder %s1742_s20, %s1742_s20 }
  0x9a   : > { %p1745_p12 = pnand %p1743_p9, %p2897_p8 }
  0x9b   : > { %p1752_p2 = por %p1751_p11, %p1750_p6 }
  0x9c   : > { %p1746_p13 = pneg %p1745_p12 }
  0x9e   : > { %p1753_p5 = pnand %p1752_p2, %p1746_p13 }
  0xa0   : > { %1756 = shalt.err (!%p1753_p5)
}
  0xa1   : > { %s1930_s28 = smov [#allocation18]   ;;  %s1308_s1 = sshll.u32 %s2106_s25, 5 }
  0xa2   : > { %1504 = dma.vmem_to_smem (!%p2898_p4), %s389_s8, 64, %s1930_s28, [#allocation17]  }
  0xa3   : > { %s1443_s22 = sshll.u32 %s1915_s17, 9  ;;  %s403_s4 = scalar_lea.vmem [#allocation2], %s1308_s1 }
  0xa4   : > { %s2199_s12 = scalar_lea.hbm %s2834_s0, %s1443_s22  ;;  %s411_s24 = sshll.u32 %s403_s4, 4  ;;  %s2201_s24 = int_to_ptr.vmem [resolvable:$true] %s411_s24 }
  0xa5   : > { %s400_s30 = scalar_lea.sflag [#allocation3], %s2106_s25  ;;  %s1757_s27 = scalar_lea.hbm %s2199_s12, 512 }
  0xa6   : > { %p1758_p8 = scmp.ne.s32.totalorder %s2199_s12, %s1757_s27  ;;  %p2899_p7 = scmp.ne.s32.totalorder %s2895_s6, 0 }
  0xa7   : > { %s1762_s20 = scalar_lea.hbm %s2834_s0, 1024  ;;  %p1763_p10 = scmp.lt.u32.totalorder %s2199_s12, %s2834_s0 }
  0xa8   : > { %p1760_p4 = pnand %p1758_p8, %p2899_p7  ;;  %p1764_p0 = scmp.lt.u32.totalorder %s1762_s20, %s1757_s27 }
  0xa9   : > { %p1766_p9 = scmp.lt.u32.totalorder %s1757_s27, %s2199_s12 }
  0xaa   : > { %p1761_p3 = pneg %p1760_p4  ;;  %p1765_p1 = por %p1764_p0, %p1763_p10 }
  0xac   : > { %p1767_p12 = por %p1766_p9, %p1765_p1 }
  0xae   : > { %p1768_p13 = pnand %p1767_p12, %p1761_p3 }
  0xb0   : > { %1771 = shalt.err (!%p1768_p13)
}
  0xb1   : > { %s1772_s1 = scalar_lea.vmem %s2201_s24, 512  ;;  %s1931_s19 = smov [#allocation2]  }
  0xb2   : > { %p1773_p6 = scmp.ne.s32.totalorder %s2201_s24, %s1772_s1  ;;  %s1777_s15 = sshll.u32 %s1931_s19, 4  ;;  %s1778_s15 = int_to_ptr.vmem [resolvable:$false] %s1777_s15 }
  0xb3   : > { %s1779_s4 = scalar_lea.vmem %s1778_s15, 1024  ;;  %p1780_p5 = scmp.lt.s32.totalorder %s2201_s24, %s1778_s15 }
  0xb4   : > { %p1775_p11 = pnand %p1773_p6, %p2899_p7  ;;  %p1781_p8 = scmp.lt.s32.totalorder %s1779_s4, %s1772_s1 }
  0xb6   : > { %p1776_p2 = pneg %p1775_p11  ;;  %p1782_p4 = por %p1781_p8, %p1780_p5 }
  0xb8   : > { %p1783_p10 = pnand %p1782_p4, %p1776_p2 }
  0xba   : > { %1786 = shalt.err (!%p1783_p10)
}
  0xbb   : > { %p2900_p3 = scmp.ne.s32.totalorder %s2893_s21, 0  ;;  %s1787_s27 = scalar_lea.hbm %s2127_s18, 256 }
  0xbc   : > { %p1788_p0 = scmp.ne.s32.totalorder %s2127_s18, %s1787_s27  ;;  %s1792_s20 = scalar_lea.hbm %s2836_s2, 512 }
  0xbd   : > { %1508 = dma.hbm_to_vmem [thread:$0]  (!%p2900_p3), %s2199_s12, 512, %s2201_s24, %s400_s30, %s1925_s10, %s1925_s10, %s1926_s29  }
  0xbe   : > { %p1790_p1 = pnand %p1788_p0, %p2899_p7  ;;  %p1793_p12 = scmp.lt.u32.totalorder %s2127_s18, %s2836_s2 }
  0xbf   : > { %p1794_p13 = scmp.lt.u32.totalorder %s1792_s20, %s1787_s27  ;;  %p1796_p11 = scmp.lt.u32.totalorder %s1787_s27, %s2127_s18 }
  0xc0   : > { %p1791_p9 = pneg %p1790_p1 }
  0xc1   : > { %p1795_p6 = por %p1794_p13, %p1793_p12 }
  0xc3   : > { %p1797_p2 = por %p1796_p11, %p1795_p6 }
  0xc5   : > { %p1798_p5 = pnand %p1797_p2, %p1791_p9 }
  0xc7   : > { %1801 = shalt.err (!%p1798_p5)
}
  0xc8   : > { %s1802_s25 = scalar_lea.vmem %s2164_s26, 256  ;;  %s1932_s12 = smov [#allocation8]  }
  0xc9   : > { %p1803_p8 = scmp.ne.s32.totalorder %s2164_s26, %s1802_s25  ;;  %s1807_s24 = sshll.u32 %s1932_s12, 4  ;;  %s1808_s24 = int_to_ptr.vmem [resolvable:$false] %s1807_s24 }
  0xca   : > { %s1809_s30 = scalar_lea.vmem %s1808_s24, 512  ;;  %p1810_p0 = scmp.lt.s32.totalorder %s2164_s26, %s1808_s24 }
  0xcb   : > { %p1805_p4 = pnand %p1803_p8, %p2899_p7  ;;  %p1811_p1 = scmp.lt.s32.totalorder %s1809_s30, %s1802_s25 }
  0xcd   : > { %p1806_p10 = pneg %p1805_p4  ;;  %p1812_p12 = por %p1811_p1, %p1810_p0 }
  0xcf   : > { %p1813_p13 = pnand %p1812_p12, %p1806_p10 }
  0xd1   : > { %1816 = shalt.err (!%p1813_p13)
}
  0xd2   : > { %1514 = dma.hbm_to_vmem [thread:$0]  (!%p2900_p3), %s2127_s18, 256, %s2164_s26, %s2129_s13, %s1925_s10, %s1925_s10, %s1926_s29  }
  0xd3   : > { %p2901_p7 = scmp.ne.s32.totalorder %s2880_s23, 0 }
  0xd4   : > { %s2258_s6 = sand.u32 (!%p2901_p7), 1, %s1903_s14   ;;  %p2902_p9 = scmp.ne.s32.totalorder (!%p2901_p7), %s2887_s11, 0 }
  0xd5   : > { %467 = sbr.rel (%p2901_p7) target bundleno = 375 (0x177), region = 60  ;;  %s1318_s1 = sshll.u32 (!%p2901_p7), %s2258_s6, 5 }
  0xd6   : > { %s470_s19 = scalar_lea.sflag (!%p2901_p7), [#allocation3], %s2258_s6  ;;  %s2262_s15 = scalar_lea.vmem (!%p2901_p7), [#allocation2], %s1318_s1 }
  0xdc   : > { %1870 = dma.done.wait (%p2902_p9), %s470_s19, 512  }
  0xdd   : > { %1872 = vsyncadd (%p2902_p9), %s470_s19, 4294966784  ;;  %s2903_s21 = sld [smem:[#allocation31_spill]]  ;;  %s2270_s18 = sshll.u32 %s2258_s6, 4 }
  0xde   : > { %s482_s10 = scalar_lea.vmem [#allocation6], %s2270_s18 }
  0xe3   : > { %s478_s13 = sand.u32 1, %s2903_s21  }
  0xe4   : > { %s479_s23 = scalar_lea.sflag [#allocation7], %s478_s13 }
  0xe5   : > { %1874 = dma.done.wait (%p2902_p9), %s479_s23, 512  }
  0xe6   : > { %1876 = vsyncadd (%p2902_p9), %s479_s23, 4294966784  ;;  %s2278_s29 = scalar_lea.vmem [#allocation8], %s2270_s18  ;;  %p2904_p3 = scmp.eq.s32.totalorder %s2903_s21, 0 }
  0xe8   : > { %1878 = dma.done.wait (%p2904_p3), [#allocation5], 128   ;;  %p2905_p6 = pmov %p2904_p3 }
  0xe9   : > { %p2906_p11 = pmov %p2904_p3 }
  0xea   : > { %1880 = vsyncadd (%p2905_p6), [#allocation5], 4294967168 }
  0xeb   : > { %1882 = dma.done.wait (%p2906_p11), [#allocation11], 32   ;;  %p2907_p2 = pmov %p2904_p3 }
  0xed   : > { %1884 = vsyncadd (%p2907_p2), [#allocation11], 4294967264  ;;  %p2908_p5 = pmov %p2907_p2 }
  0xee   : > { %p2909_p8 = pmov %p2907_p2 }
  0xef   : > { %1886 = dma.done.wait (%p2908_p5), [#allocation14], 144  }
  0xf0   : > { %1888 = vsyncadd (%p2909_p8), [#allocation14], 4294967152  ;;  %p2910_p4 = pmov %p2907_p2 }
  0xf1   : > { %p2911_p10 = pmov %p2907_p2 }
  0xf2   : > { %1890 = dma.done.wait (%p2910_p4), [#allocation17], 80  }
  0xf3   : > { %1892 = vsyncadd (%p2911_p10), [#allocation17], 4294967216 }
  0xf4   : > { %524 = sfence }
  0xf5   : > { %v2296_v0 = vld [vmem:[%s482_s10] sm:$0xf]  ;;  %v2298_v1 = vld [vmem:[%s482_s10 + $0x4] sm:$0xf]  ;;  %v2306_v5 = vld [vmem:[%s482_s10 + $0x8] sm:$0xf] }
  0xf6   : > { %v664_v2 = vmul.f32 %v2296_v0, %v2296_v0  ;;  %v676_v3 = vmul.f32 %v2298_v1, %v2298_v1  ;;  %v675_v4 = vadd.f32 %v2298_v1, %v2296_v0  ;;  %v693_v7 = vmul.f32 %v2306_v5, %v2306_v5  ;;  %v2311_v9 = vld [vmem:[%s482_s10 + $0xc] sm:$0xf]  ;;  %s2315_s11 = sld [smem:[#allocation9]]  ;;  %s2317_s26 = sld [smem:[#allocation9 + $0x1]]  ;;  %v2321_v13 = vld [vmem:[%s2278_s29] sm:$0xf] }
  0xf7   : > { %v710_v11 = vmul.f32 %v2311_v9, %v2311_v9  ;;  %s2323_s4 = sld [smem:[#allocation9 + $0x2]]  ;;  %s2325_s27 = sld [smem:[#allocation9 + $0x80]]  ;;  %v726_v15 = vmul.f32 %v2321_v13, %v2321_v13  ;;  %v2337_v17 = vld [vmem:[%s2278_s29 + $0x4] sm:$0xf]  ;;  %v846_v20 = vld [vmem:[%s2262_s15] sm:$0xf] }
  0xf8   : > { %v677_v6 = vadd.f32 %v676_v3, %v664_v2  ;;  %v692_v8 = vadd.f32 %v2306_v5, %v675_v4  ;;  %s2327_s8 = sld [smem:[#allocation9 + $0x81]]  ;;  %s2329_s16 = sld [smem:[#allocation9 + $0x82]]  ;;  %v743_v19 = vmul.f32 %v2337_v17, %v2337_v17  ;;  %v2349_v21 = vld [vmem:[%s2262_s15 + $0x4] sm:$0xf]  ;;  %v2357_v23 = vld [vmem:[%s2278_s29 + $0x8] sm:$0xf]  ;;  %v847_v28 = vmul.f32 %v846_v20, %v846_v20 }
  0xf9   : > { %s2331_s20 = sld [smem:[#allocation9 + $0x3]]  ;;  %s2341_s22 = sld [smem:[#allocation13]]  ;;  %v859_v29 = vmul.f32 %v2349_v21, %v2349_v21  ;;  %v760_v33 = vmul.f32 %v2357_v23, %v2357_v23  ;;  %v2380_v34 = vld [vmem:[%s2278_s29 + $0xc] sm:$0xf]  ;;  %v858_v36 = vadd.f32 %v2349_v21, %v846_v20  ;;  %v2391_v40 = vld [vmem:[%s2262_s15 + $0x8] sm:$0xf] }
  0xfa   : > { %v694_v10 = vadd.f32 %v693_v7, %v677_v6  ;;  %v709_v12 = vadd.f32 %v2311_v9, %v692_v8  ;;  %s2339_s28 = sld [smem:[#allocation9 + $0x83]]  ;;  %s2343_s25 = sld [smem:[#allocation13 + $0x80]]  ;;  %v777_v46 = vmul.f32 %v2380_v34, %v2380_v34 }
  0xfb   : > { %s2351_s12 = sld [smem:[#allocation13 + $0x1]]  ;;  %s2359_s30 = sld [smem:[#allocation13 + $0x2]]  ;;  %v2402_v48 = vadd.f32 %v859_v29, %v847_v28  ;;  %v2411_v52 = vadd.f32 %v2391_v40, %v858_v36 }
  0xfc   : > { %v711_v14 = vadd.f32 %v710_v11, %v694_v10  ;;  %v725_v16 = vadd.f32 %v2321_v13, %v709_v12  ;;  %s2353_s24 = sld [smem:[#allocation13 + $0x81]]  ;;  %s2361_s1 = sld [smem:[#allocation13 + $0x3]]  ;;  %v848_v24 = vstv %s2315_s11  ;;  %v850_v25 = vstv %s2317_s26 }
  0xfd   : > { %v852_v26 = vstv %s2323_s4  ;;  %v861_v27 = vstv %s2325_s27  ;;  %s2367_s19 = sld [smem:[#allocation13 + $0x82]]  ;;  %s2369_s21 = sld [smem:[#allocation13 + $0x83]]  ;;  %v849_v38 = vmul.f32 %v848_v24, %v846_v20  ;;  %v851_v41 = vmul.f32 %v850_v25, %v846_v20 }
  0xfe   : > { %v727_v18 = vadd.f32 %v726_v15, %v711_v14  ;;  %v742_v22 = vadd.f32 %v2337_v17, %v725_v16  ;;  %v864_v30 = vstv %s2327_s8  ;;  %v867_v31 = vstv %s2329_s16  ;;  %s2375_s13 = sld [smem:[#allocation13 + $0x100]]  ;;  %s2386_s10 = sld [smem:[#allocation13 + $0x101]] }
  0xff   : > { %v854_v35 = vstv %s2331_s20  ;;  %s2384_s23 = sld [smem:[#allocation9 + $0x100]]  ;;  %v862_v39 = vmul.f32 %v2349_v21, %v861_v27  ;;  %v853_v42 = vmul.f32 %v852_v26, %v846_v20  ;;  %v865_v43 = vmul.f32 %v2349_v21, %v864_v30  ;;  %s2395_s29 = sld [smem:[#allocation13 + $0x102]] }
 0x100   : > { %v744_v32 = vadd.f32 %v743_v19, %v727_v18  ;;  %v759_v37 = vadd.f32 %v2357_v23, %v742_v22  ;;  %v868_v44 = vmul.f32 %v2349_v21, %v867_v31  ;;  %v665_v45 = vstv %s2341_s22  ;;  %s2404_s11 = sld [smem:[#allocation13 + $0x103]]  ;;  %s2406_s26 = sld [smem:[#allocation13 + $0x180]] }
 0x101   : > { %v2400_v47 = vmul.f32 %v854_v35, %v846_v20  ;;  %v678_v49 = vstv %s2343_s25  ;;  %v870_v51 = vstv %s2339_s28  ;;  %s2413_s4 = sld [smem:[#allocation13 + $0x181]]  ;;  %v667_v53 = vstv %s2351_s12  ;;  %s2428_s8 = sld [smem:[#allocation13 + $0x182]] }
 0x102   : > { %v761_v50 = vadd.f32 %v760_v33, %v744_v32  ;;  %v681_v54 = vstv %s2353_s24  ;;  %v776_v55 = vadd.f32 %v2380_v34, %v759_v37  ;;  %v2418_v56 = vadd.f32 %v862_v39, %v849_v38  ;;  %s2420_s27 = sld [smem:[#allocation9 + $0x101]]  ;;  %s2434_s16 = sld [smem:[#allocation13 + $0x183]] }
 0x103   : > { %v666_v57 = vmul.f32 %v665_v45, %v2296_v0  ;;  %v669_v58 = vstv %s2359_s30  ;;  %v2424_v59 = vadd.f32 %v865_v43, %v851_v41  ;;  %v2426_v60 = vadd.f32 %v868_v44, %v853_v42  ;;  %s2440_s20 = sld [smem:[#allocation13 + $0x200]]  ;;  %s2442_s28 = sld [smem:[#allocation13 + $0x201]] }
 0x104   : > { %v671_v61 = vstv %s2361_s1  ;;  %v679_v62 = vmul.f32 %v2298_v1, %v678_v49  ;;  %v684_v63 = vstv %s2367_s19  ;;  %v687_v2 = vstv %s2369_s21  ;;  %s2448_s22 = sld [smem:[#allocation9 + $0x102]]  ;;  %s2463_s12 = sld [smem:[#allocation13 + $0x203]] }
 0x105   : > { %v668_v3 = vmul.f32 %v667_v53, %v2296_v0  ;;  %v682_v4 = vmul.f32 %v2298_v1, %v681_v54  ;;  %v695_v6 = vstv %s2375_s13  ;;  %v871_v7 = vmul.f32 %v2349_v21, %v870_v51  ;;  %s2454_s25 = sld [smem:[#allocation13 + $0x202]]  ;;  %s2469_s24 = sld [smem:[#allocation13 + $0x280]] }
 0x106   : > { %v698_v8 = vstv %s2386_s10  ;;  %v778_v10 = vadd.f32 %v777_v46, %v761_v50  ;;  %v2445_v11 = vmul.f32 0.125, %v776_v55  ;;  %v878_v12 = vstv %s2384_s23  ;;  %s2471_s30 = sld [smem:[#allocation13 + $0x281]]  ;;  %s2475_s1 = sld [smem:[#allocation9 + $0x103]] }
 0x107   : > { %v670_v14 = vmul.f32 %v669_v58, %v2296_v0  ;;  %v672_v15 = vmul.f32 %v671_v61, %v2296_v0  ;;  %v685_v16 = vmul.f32 %v2298_v1, %v684_v63  ;;  %v688_v18 = vmul.f32 %v2298_v1, %v687_v2  ;;  %s2477_s19 = sld [smem:[#allocation13 + $0x282]]  ;;  %s2487_s21 = sld [smem:[#allocation13 + $0x283]] }
 0x108   : > { %v680_v19 = vadd.f32 %v679_v62, %v666_v57  ;;  %v696_v20 = vmul.f32 %v2306_v5, %v695_v6  ;;  %v701_v21 = vstv %s2395_s29  ;;  %v876_v22 = vmul.f32 %v2391_v40, %v2391_v40  ;;  %s2492_s13 = sld [smem:[#allocation13 + $0x300]]  ;;  %s2500_s23 = sld [smem:[#allocation13 + $0x301]] }
 0x109   : > { %v683_v24 = vadd.f32 %v682_v4, %v668_v3  ;;  %v699_v25 = vmul.f32 %v2306_v5, %v698_v8  ;;  %v704_v26 = vstv %s2404_s11  ;;  %v712_v27 = vstv %s2406_s26  ;;  %s2502_s10 = sld [smem:[#allocation13 + $0x302]]  ;;  %s2508_s29 = sld [smem:[#allocation9 + $0x180]] }
 0x10a   : > { %v715_v0 = vstv %s2413_s4  ;;  %v792_v1 = vmul.f32 0.125, %v778_v10  ;;  %v793_v28 = vmul.f32 %v2445_v11, %v2445_v11  ;;  %v879_v29 = vmul.f32 %v2391_v40, %v878_v12  ;;  %s2510_s11 = sld [smem:[#allocation9 + $0x181]]  ;;  %s2515_s26 = sld [smem:[#allocation13 + $0x303]] }
 0x10b   : > { %v686_v30 = vadd.f32 %v685_v16, %v670_v14  ;;  %v689_v31 = vadd.f32 %v688_v18, %v672_v15  ;;  %v702_v32 = vmul.f32 %v2306_v5, %v701_v21  ;;  %v881_v33 = vstv %s2420_s27  ;;  %s2526_s4 = sld [smem:[#allocation13 + $0x380]]  ;;  %s2528_s27 = sld [smem:[#allocation13 + $0x381]]  ;;  %v2541_v21 = vld [vmem:[%s2262_s15 + $0x10] sm:$0xf] }
 0x10c   : > { %v697_v35 = vadd.f32 %v696_v20, %v680_v19  ;;  %v705_v36 = vmul.f32 %v2306_v5, %v704_v26  ;;  %v713_v37 = vmul.f32 %v2311_v9, %v712_v27  ;;  %v718_v38 = vstv %s2428_s8  ;;  %s2537_s8 = sld [smem:[#allocation13 + $0x382]] }
 0x10d   : > { %v700_v39 = vadd.f32 %v699_v25, %v683_v24  ;;  %v716_v41 = vmul.f32 %v2311_v9, %v715_v0  ;;  %v2484_v42 = vadd.f32 %v871_v7, %v2400_v47  ;;  %v877_v43 = vadd.f32 %v876_v22, %v2402_v48  ;;  %v2498_v47 = vld [vmem:[%s2262_s15 + $0xc] sm:$0xf] }
 0x10e   : > { %v721_v44 = vstv %s2434_s16  ;;  %v728_v45 = vstv %s2440_s20  ;;  %v731_v46 = vstv %s2442_s28  ;;  %v794_v5 = vsub.f32 %v792_v1, %v793_v28  ;;  %s2543_s16 = sld [smem:[#allocation9 + $0x182]]  ;;  %s2545_s20 = sld [smem:[#allocation13 + $0x383]] }
 0x10f   : > { %v703_v49 = vadd.f32 %v702_v32, %v686_v30  ;;  %v719_v50 = vmul.f32 %v2311_v9, %v718_v38  ;;  %v882_v51 = vmul.f32 %v2391_v40, %v881_v33  ;;  %v884_v53 = vstv %s2448_s22  ;;  %v2561_v33 = vld [vmem:[%s2262_s15 + $0x14] sm:$0xf]  ;;  %s2563_s28 = sld [smem:[#allocation9 + $0x183]]  ;;  %s2570_s22 = sld [smem:[#allocation16]] }
 0x110   : > { %v706_v48 = vadd.f32 %v705_v36, %v689_v31  ;;  %v714_v54 = vadd.f32 %v713_v37, %v697_v35  ;;  %v734_v55 = vstv %s2454_s25  ;;  %v2506_v57 = vadd.f32 %v879_v29, %v2418_v56  ;;  %s2576_s25 = sld [smem:[#allocation9 + $0x200]] }
 0x111   : > { %v717_v58 = vadd.f32 %v716_v41, %v700_v39  ;;  %v722_v61 = vmul.f32 %v2311_v9, %v721_v44  ;;  %v729_v62 = vmul.f32 %v728_v45, %v2321_v13  ;;  %v732_v63 = vmul.f32 %v731_v46, %v2321_v13 }
 0x112   : > { %v737_v2 = vstv %s2463_s12  ;;  %v795_v3 = vadd.f32 1e-05, %v794_v5  ;;  %v2519_v56 = vmul.f32 %v2391_v40, %v884_v53  ;;  %v893_v4 = vmul.f32 %v2498_v47, %v2498_v47  ;;  %s2578_s12 = sld [smem:[#allocation16 + $0x1]]  ;;  %v2584_v53 = vld [vmem:[%s2262_s15 + $0x18] sm:$0xf] }
 0x113   : > { %v720_v6 = vadd.f32 %v719_v50, %v703_v49  ;;  %v735_v7 = vmul.f32 %v734_v55, %v2321_v13  ;;  %v745_v9 = vstv %s2469_s24  ;;  %v748_v8 = vstv %s2471_s30  ;;  %s2586_s24 = sld [smem:[#allocation15]]  ;;  %s2592_s30 = sld [smem:[#allocation9 + $0x201]] }
 0x114   : > { %v751_v10 = vstv %s2477_s19  ;;  %v2532_v12 = vadd.f32 %v882_v51, %v2424_v59  ;;  %v887_v14 = vstv %s2475_s1  ;;  %v892_v15 = vadd.f32 %v2498_v47, %v2411_v52  ;;  %s2594_s1 = sld [smem:[#allocation9 + $0x202]]  ;;  %s2600_s19 = sld [smem:[#allocation9 + $0x203]] }
 0x115   : > { %v723_v16 = vadd.f32 %v722_v61, %v706_v48  ;;  %v730_v18 = vadd.f32 %v729_v62, %v714_v54  ;;  %v733_v19 = vadd.f32 %v732_v63, %v717_v58  ;;  %v738_v20 = vmul.f32 %v737_v2, %v2321_v13 }
 0x116   : > { %v746_v52 = vmul.f32 %v2337_v17, %v745_v9  ;;  %v749_v59 = vmul.f32 %v2337_v17, %v748_v8  ;;  %v754_v22 = vstv %s2487_s21  ;;  %1594 = vrsqrt.f32 %v795_v3  ;;  %s2605_s21 = sld [smem:[#allocation15 + $0x1]] }
 0x117   : > { %v736_v24 = vadd.f32 %v735_v7, %v720_v6  ;;  %v752_v25 = vmul.f32 %v2337_v17, %v751_v10  ;;  %v888_v13 = vmul.f32 %v2391_v40, %v887_v14  ;;  %v894_v26 = vadd.f32 %v893_v4, %v877_v43 }
 0x118   : > { %v762_v27 = vstv %s2492_s13  ;;  %v765_v0 = vstv %s2500_s23  ;;  %v768_v1 = vstv %s2502_s10  ;;  %v910_v28 = vmul.f32 %v2541_v21, %v2541_v21  ;;  %s2607_s13 = sld [smem:[#allocation15 + $0x2]]  ;;  %s2618_s10 = sld [smem:[#allocation9 + $0x280]] }
 0x119   : > { %v739_v29 = vadd.f32 %v738_v20, %v723_v16  ;;  %v755_v30 = vmul.f32 %v2337_v17, %v754_v22  ;;  %v895_v31 = vstv %s2508_s29  ;;  %v898_v32 = vstv %s2510_s11  ;;  %s2612_s23 = sld [smem:[#allocation16 + $0x2]]  ;;  %s2626_s29 = sld [smem:[#allocation9 + $0x281]] }
 0x11a   : > { %v747_v35 = vadd.f32 %v746_v52, %v730_v18  ;;  %v750_v40 = vadd.f32 %v749_v59, %v733_v19  ;;  %v771_v36 = vstv %s2515_s26  ;;  %v909_v37 = vadd.f32 %v2541_v21, %v892_v15  ;;  %s2628_s11 = sld [smem:[#allocation16 + $0x3]]  ;;  %s2632_s26 = sld [smem:[#allocation9 + $0x282]] }
 0x11b   : > { %v753_v38 = vadd.f32 %v752_v25, %v736_v24  ;;  %v763_v39 = vmul.f32 %v2357_v23, %v762_v27  ;;  %v766_v41 = vmul.f32 %v2357_v23, %v765_v0  ;;  %v769_v17 = vmul.f32 %v2357_v23, %v768_v1 }
 0x11c   : > { %v779_v43 = vstv %s2526_s4  ;;  %v782_v44 = vstv %s2528_s27  ;;  %v911_v45 = vadd.f32 %v910_v28, %v894_v26  ;;  %v927_v46 = vmul.f32 %v2561_v33, %v2561_v33  ;;  %s2646_s4 = sld [smem:[#allocation9 + $0x300]]  ;;  %s2650_s27 = sld [smem:[#allocation9 + $0x301]] }
 0x11d   : > { %v756_v5 = vadd.f32 %v755_v30, %v739_v29  ;;  %v772_v49 = vmul.f32 %v2357_v23, %v771_v36  ;;  %v785_v50 = vstv %s2537_s8  ;;  %v896_v51 = vmul.f32 %v2498_v47, %v895_v31  ;;  %s2652_s8 = sld [smem:[#allocation9 + $0x302]] }
 0x11e   : > { %v788_v48 = vstv %s2545_s20  ;;  %v899_v54 = vmul.f32 %v2498_v47, %v898_v32  ;;  %v901_v55 = vstv %s2543_s16  ;;  %v926_v58 = vadd.f32 %v2561_v33, %v909_v37  ;;  %s2657_s16 = sld [smem:[#allocation9 + $0x303]] }
 0x11f   : > { %v764_v61 = vadd.f32 %v763_v39, %v747_v35  ;;  %v767_v62 = vadd.f32 %v766_v41, %v750_v40  ;;  %v780_v23 = vmul.f32 %v2380_v34, %v779_v43  ;;  %v783_v63 = vmul.f32 %v2380_v34, %v782_v44  ;;  %s2659_s20 = sld [smem:[#allocation15 + $0x3]] }
 0x120   : > { %v2598_v2 = vpop.eup %1594  ;;  %v770_v3 = vadd.f32 %v769_v17, %v753_v38  ;;  %v786_v4 = vmul.f32 %v2380_v34, %v785_v50  ;;  %v928_v6 = vadd.f32 %v927_v46, %v911_v45  ;;  %v944_v7 = vmul.f32 %v2584_v53, %v2584_v53 }
 0x121   : > { %v773_v9 = vadd.f32 %v772_v49, %v756_v5  ;;  %v789_v8 = vmul.f32 %v2380_v34, %v788_v48  ;;  %v886_v10 = vadd.f32 %v2519_v56, %v2426_v60  ;;  %v889_v14 = vadd.f32 %v888_v13, %v2484_v42  ;;  %v2624_v56 = vld [vmem:[%s2262_s15 + $0x1c] sm:$0xf]  ;;  %s2637_s15 = sld [smem:[#allocation9 + $0x283]] }
 0x122   : > { %v902_v15 = vmul.f32 %v2498_v47, %v901_v55  ;;  %v904_v16 = vstv %s2563_s28  ;;  %v943_v18 = vadd.f32 %v2584_v53, %v926_v58  ;;  %v781_v19 = vadd.f32 %v780_v23, %v764_v61  ;;  %s2672_s28 = sld [smem:[#allocation9 + $0x380]] }
 0x123   : > { %v784_v20 = vadd.f32 %v783_v63, %v767_v62  ;;  %v797_v34 = vmul.f32 %v2598_v2, %v2445_v11  ;;  %v897_v60 = vadd.f32 %v896_v51, %v2506_v57  ;;  %v787_v42 = vadd.f32 %v786_v4, %v770_v3 }
 0x124   : > { %v799_v52 = vstv %s2570_s22  ;;  %v900_v59 = vadd.f32 %v899_v54, %v2532_v12  ;;  %v945_v22 = vadd.f32 %v944_v7, %v928_v6  ;;  %v790_v24 = vadd.f32 %v789_v8, %v773_v9  ;;  %s2676_s22 = sld [smem:[#allocation9 + $0x381]] }
 0x125   : > { %v805_v11 = vstv %s2578_s12  ;;  %v905_v57 = vmul.f32 %v2498_v47, %v904_v16  ;;  %v912_v25 = vstv %s2576_s25  ;;  %v802_v13 = vstv %s2586_s24  ;;  %s2678_s25 = sld [smem:[#allocation9 + $0x382]]  ;;  %s2682_s12 = sld [smem:[#allocation9 + $0x383]] }
 0x126   : > { %v903_v26 = vadd.f32 %v902_v15, %v886_v10  ;;  %v960_v27 = vadd.f32 %v2624_v56, %v943_v18  ;;  %v961_v12 = vmul.f32 %v2624_v56, %v2624_v56  ;;  %v798_v0 = vmul.f32 %v2598_v2, %v781_v19  ;;  %s2700_s24 = sld [smem:[#allocation12]] }
 0x127   : > { %v800_v1 = vmul.f32 %v799_v52, %v797_v34  ;;  %v915_v28 = vstv %s2592_s30  ;;  %v918_v29 = vstv %s2594_s1  ;;  %v804_v47 = vmul.f32 %v2598_v2, %v784_v20  ;;  %s2702_s30 = sld [smem:[#allocation12 + $0x1]]  ;;  %s2705_s1 = sld [smem:[#allocation12 + $0x2]] }
 0x128   : > { %v806_v30 = vmul.f32 %v805_v11, %v797_v34  ;;  %v921_v31 = vstv %s2600_s19  ;;  %v962_v32 = vadd.f32 %v961_v12, %v945_v22  ;;  %v808_v35 = vstv %s2605_s21  ;;  %s2707_s19 = sld [smem:[#allocation12 + $0x3]]  ;;  %s2712_s21 = sld [smem:[#allocation10]] }
 0x129   : > { %v814_v40 = vstv %s2607_s13  ;;  %v906_v36 = vadd.f32 %v905_v57, %v889_v14  ;;  %v913_v37 = vmul.f32 %v2541_v21, %v912_v25  ;;  %v811_v38 = vstv %s2612_s23  ;;  %s2715_s13 = sld [smem:[#allocation10 + $0x1]]  ;;  %s2717_s23 = sld [smem:[#allocation10 + $0x2]] }
 0x12a   : > { %v916_v39 = vmul.f32 %v2541_v21, %v915_v28  ;;  %v2663_v41 = vmul.f32 0.125, %v960_v27  ;;  %v976_v17 = vmul.f32 0.125, %v962_v32  ;;  %v801_v43 = vsub.f32 %v798_v0, %v800_v1 }
 0x12b   : > { %v919_v44 = vmul.f32 %v2541_v21, %v918_v29  ;;  %v922_v45 = vmul.f32 %v2541_v21, %v921_v31  ;;  %v929_v46 = vstv %s2618_s10  ;;  %v807_v5 = vsub.f32 %v804_v47, %v806_v30  ;;  %s2719_s10 = sld [smem:[#allocation10 + $0x3]] }
 0x12c   : > { %v817_v49 = vstv %s2628_s11  ;;  %v932_v50 = vstv %s2626_s29  ;;  %v977_v51 = vmul.f32 %v2663_v41, %v2663_v41  ;;  %v810_v48 = vmul.f32 %v2598_v2, %v787_v42  ;;  %s2730_s29 = sld [smem:[#allocation18]] }
 0x12d   : > { %v812_v54 = vmul.f32 %v811_v38, %v797_v34  ;;  %v914_v55 = vadd.f32 %v913_v37, %v897_v60  ;;  %v935_v58 = vstv %s2632_s26  ;;  %v917_v21 = vadd.f32 %v916_v39, %v900_v59  ;;  %s2732_s11 = sld [smem:[#allocation18 + $0x80]] }
 0x12e   : > { %v930_v61 = vmul.f32 %v2561_v33, %v929_v46  ;;  %v938_v62 = vstv %s2637_s15  ;;  %v978_v23 = vsub.f32 %v976_v17, %v977_v51  ;;  %v803_v63 = vadd.f32 %v802_v13, %v801_v43  ;;  %s2734_s26 = sld [smem:[#allocation18 + $0x100]] }
 0x12f   : > { %v816_v3 = vmul.f32 %v2598_v2, %v790_v24  ;;  %v818_v4 = vmul.f32 %v817_v49, %v797_v34  ;;  %v933_v6 = vmul.f32 %v2561_v33, %v932_v50  ;;  %v809_v7 = vadd.f32 %v808_v35, %v807_v5  ;;  %s2736_s15 = sld [smem:[#allocation18 + $0x180]] }
 0x130   : > { %v920_v9 = vadd.f32 %v919_v44, %v903_v26  ;;  %v923_v8 = vadd.f32 %v922_v45, %v906_v36  ;;  %v936_v10 = vmul.f32 %v2561_v33, %v935_v58  ;;  %v813_v14 = vsub.f32 %v810_v48, %v812_v54 }
 0x131   : > { %v939_v15 = vmul.f32 %v2561_v33, %v938_v62  ;;  %v946_v16 = vstv %s2646_s4  ;;  %v949_v18 = vstv %s2650_s27  ;;  %v820_v19 = vstv %s2659_s20  ;;  %s2738_s4 = sld [smem:[#allocation18 + $0x1]]  ;;  %s2746_s20 = sld [smem:[#allocation18 + $0x2]] }
 0x132   : > { %v952_v20 = vstv %s2652_s8  ;;  %v955_v60 = vstv %s2657_s16  ;;  %v979_v2 = vadd.f32 1e-05, %v978_v23  ;;  %v819_v34 = vsub.f32 %v816_v3, %v818_v4  ;;  %s2740_s27 = sld [smem:[#allocation18 + $0x81]] }
 0x133   : > { %v1424_v42 = vmul.f32 -1.442695, %v803_v63  ;;  %v931_v52 = vadd.f32 %v930_v61, %v914_v55  ;;  %v934_v59 = vadd.f32 %v933_v6, %v917_v21  ;;  %v1425_v22 = vmul.f32 -1.442695, %v809_v7  ;;  %s2742_s8 = sld [smem:[#allocation18 + $0x101]] }
 0x134   : > { %v937_v24 = vadd.f32 %v936_v10, %v920_v9  ;;  %v947_v11 = vmul.f32 %v2584_v53, %v946_v16  ;;  %v950_v33 = vmul.f32 %v2584_v53, %v949_v18  ;;  %v815_v57 = vadd.f32 %v814_v40, %v813_v14  ;;  %s2744_s16 = sld [smem:[#allocation18 + $0x181]] }
 0x135   : > { %v940_v25 = vadd.f32 %v939_v15, %v923_v8  ;;  %v953_v13 = vmul.f32 %v2584_v53, %v952_v20  ;;  %v956_v26 = vmul.f32 %v2584_v53, %v955_v60  ;;  %v963_v27 = vstv %s2672_s28  ;;  %s2748_s28 = sld [smem:[#allocation18 + $0x82]] }
 0x136   : > { %v966_v12 = vstv %s2676_s22  ;;  %v969_v0 = vstv %s2678_s25  ;;  %1596 = vrsqrt.f32 %v979_v2  ;;  %v821_v1 = vadd.f32 %v820_v19, %v819_v34  ;;  %s2750_s22 = sld [smem:[#allocation18 + $0x102]] }
 0x137   : > { %1598 = vpow2.f32 %v1424_v42  ;;  %v972_v28 = vstv %s2682_s12  ;;  %v948_v29 = vadd.f32 %v947_v11, %v931_v52  ;;  %v951_v47 = vadd.f32 %v950_v33, %v934_v59  ;;  %s2752_s25 = sld [smem:[#allocation18 + $0x182]]  ;;  %s2754_s12 = sld [smem:[#allocation18 + $0x3]] }
 0x138   : > { %1600 = vpow2.f32 %v1425_v22  ;;  %v954_v30 = vadd.f32 %v953_v13, %v937_v24  ;;  %v964_v53 = vmul.f32 %v2624_v56, %v963_v27  ;;  %v967_v31 = vmul.f32 %v2624_v56, %v966_v12 }
 0x139   : > { %v970_v32 = vmul.f32 %v2624_v56, %v969_v0  ;;  %v1426_v35 = vmul.f32 -1.442695, %v815_v57  ;;  %v957_v40 = vadd.f32 %v956_v26, %v940_v25  ;;  %v973_v36 = vmul.f32 %v2624_v56, %v972_v28 }
 0x13a   : > { %v1427_v37 = vmul.f32 -1.442695, %v821_v1  ;;  %v965_v38 = vadd.f32 %v964_v53, %v948_v29  ;;  %v968_v39 = vadd.f32 %v967_v31, %v951_v47  ;;  %v983_v45 = vstv %s2700_s24  ;;  %s2756_s24 = sld [smem:[#allocation18 + $0x83]] }
 0x13b   : > { %v971_v17 = vadd.f32 %v970_v32, %v954_v30  ;;  %1602 = vpow2.f32 %v1426_v35  ;;  %v974_v43 = vadd.f32 %v973_v36, %v957_v40  ;;  %v989_v46 = vstv %s2702_s30  ;;  %s2758_s30 = sld [smem:[#allocation18 + $0x103]] }
 0x13c   : > { %1604 = vpow2.f32 %v1427_v37  ;;  %v995_v5 = vstv %s2705_s1  ;;  %v1001_v56 = vstv %s2707_s19  ;;  %v986_v58 = vstv %s2712_s21  ;;  %s2760_s1 = sld [smem:[#allocation18 + $0x183]]  ;;  %s2912_s19 = sld [smem:[#allocation29_spill]] }
 0x13d   : > { %v992_v4 = vstv %s2715_s13  ;;  %v998_v6 = vstv %s2717_s23  ;;  %v1004_v7 = vstv %s2719_s10  ;;  %v1030_v57 = vstv %s2730_s29  ;;  %s566_s13 = scalar_lea.vmem [#allocation19], %s2270_s18  ;;  %s2913_s23 = sld [smem:[#allocation33_spill]] }
 0x13e   : > { %v1032_v26 = vstv %s2732_s11  ;;  %v1035_v27 = vstv %s2734_s26  ;;  %v1038_v12 = vstv %s2736_s15  ;;  %v1042_v29 = vstv %s2738_s4  ;;  %s1096_s10 = sshll.u32 %s566_s13, 4  ;;  %s2914_s26 = sld [smem:[#allocation40_spill]]  ;;  %s2785_s10 = int_to_ptr.vmem [resolvable:$true] %s1096_s10 }
 0x13f   : > { %v1044_v47 = vstv %s2740_s27  ;;  %v1047_v32 = vstv %s2742_s8  ;;  %v1050_v35 = vstv %s2744_s16  ;;  %s1082_s18 = scalar_lea.sflag [#allocation4], %s2258_s6  ;;  %s1817_s4 = scalar_lea.vmem %s2785_s10, 256 }
 0x140   : > { %v1597_v44 = vpop.eup %1596  ;;  %p1818_p0 = scmp.ne.s32.totalorder %s2785_s10, %s1817_s4  ;;  %s1933_s27 = smov [#allocation19]  }
 0x141   : > { %v1599_v49 = vpop.eup %1598  ;;  %v981_v50 = vmul.f32 %v1597_v44, %v2663_v41  ;;  %v982_v51 = vmul.f32 %v1597_v44, %v965_v38  ;;  %v988_v48 = vmul.f32 %v1597_v44, %v968_v39  ;;  %v994_v54 = vmul.f32 %v1597_v44, %v971_v17  ;;  %s1821_s8 = sshll.u32 %s1933_s27, 4  ;;  %s1822_s8 = int_to_ptr.vmem [resolvable:$false] %s1821_s8 }
 0x142   : > { %v1601_v55 = vpop.eup %1600  ;;  %v1000_v21 = vmul.f32 %v1597_v44, %v974_v43  ;;  %v825_v3 = vadd.f32 1.0, %v1599_v49  ;;  %v1055_v38 = vstv %s2746_s20  ;;  %v1057_v39 = vstv %s2748_s28  ;;  %s1446_s21 = sshll.u32 %s2912_s19, 8  ;;  %s1823_s16 = scalar_lea.vmem %s1822_s8, 512 }
 0x143   : > { %v984_v61 = vmul.f32 %v983_v45, %v981_v50  ;;  %v990_v62 = vmul.f32 %v989_v46, %v981_v50  ;;  %v996_v23 = vmul.f32 %v995_v5, %v981_v50  ;;  %v1002_v63 = vmul.f32 %v1001_v56, %v981_v50  ;;  %p2915_p1 = scmp.ne.s32.totalorder %s2913_s23, 0  ;;  %p1824_p7 = scmp.lt.s32.totalorder %s2785_s10, %s1822_s8 }
 0x144   : > { %v831_v15 = vadd.f32 1.0, %v1601_v55  ;;  %1606 = vrcp.f32 %v825_v3  ;;  %v1060_v45 = vstv %s2750_s22  ;;  %v1063_v46 = vstv %s2752_s25  ;;  %s2783_s15 = scalar_lea.hbm %s2914_s26, %s1446_s21  ;;  %p1825_p9 = scmp.lt.s32.totalorder %s1823_s16, %s1817_s4 }
 0x145   : > { %v985_v9 = vsub.f32 %v982_v51, %v984_v61  ;;  %v991_v8 = vsub.f32 %v988_v48, %v990_v62  ;;  %v997_v10 = vsub.f32 %v994_v54, %v996_v23  ;;  %v1003_v14 = vsub.f32 %v1000_v21, %v1002_v63  ;;  %v1603_v20 = vpop.eup %1602  ;;  %p1819_p12 = pnand %p1818_p0, %p2915_p1 }
 0x146   : > { %v1605_v60 = vpop.eup %1604  ;;  %1608 = vrcp.f32 %v831_v15  ;;  %v837_v59 = vadd.f32 1.0, %v1603_v20  ;;  %v1068_v50 = vstv %s2754_s12  ;;  %v1070_v51 = vstv %s2756_s24  ;;  %p1826_p3 = por %p1825_p9, %p1824_p7 }
 0x147   : > { %v987_v41 = vadd.f32 %v986_v58, %v985_v9  ;;  %v993_v16 = vadd.f32 %v992_v4, %v991_v8  ;;  %v999_v18 = vadd.f32 %v998_v6, %v997_v10  ;;  %v1005_v19 = vadd.f32 %v1004_v7, %v1003_v14  ;;  %p1820_p13 = pneg %p1819_p12 }
 0x148   : > { %v843_v22 = vadd.f32 1.0, %v1605_v60  ;;  %v1073_v55 = vstv %s2758_s30  ;;  %v1076_v58 = vstv %s2760_s1 }
 0x149   : > { %v1007_v2 = vmul.f32 0.70710677, %v987_v41  ;;  %v1013_v34 = vmul.f32 0.70710677, %v993_v16  ;;  %v1019_v42 = vmul.f32 0.70710677, %v999_v18  ;;  %p1827_p6 = pnand %p1826_p3, %p1820_p13 }
 0x14a   : > { %v1025_v52 = vmul.f32 0.70710677, %v1005_v19  ;;  %v1006_v33 = vmul.f32 0.5, %v987_v41  ;;  %v1012_v13 = vmul.f32 0.5, %v993_v16  ;;  %v1018_v28 = vmul.f32 0.5, %v999_v18 }
 0x14b   : > { %1610 = verf.f32 %v1007_v2  ;;  %v1024_v31 = vmul.f32 0.5, %v1005_v19 }
 0x14c   : > { %1612 = verf.f32 %v1013_v34 }
 0x14d   : > { %1614 = verf.f32 %v1019_v42 }
 0x14e   : > { %1616 = verf.f32 %v1025_v52  ;;  %v1607_v24 = vpop.eup %1606 }
 0x14f   : > { %1618 = vrcp.f32 %v837_v59 }
 0x150   : > { %1620 = vrcp.f32 %v843_v22  ;;  %v1609_v11 = vpop.eup %1608 }
 0x155   : > { %v1611_v25 = vpop.eup %1610 }
 0x156   : > { %v1613_v0 = vpop.eup %1612  ;;  %v1009_v1 = vadd.f32 1.0, %v1611_v25 }
 0x157   : > { %v1615_v30 = vpop.eup %1614  ;;  %v1015_v53 = vadd.f32 1.0, %v1613_v0 }
 0x158   : > { %v1617_v40 = vpop.eup %1616  ;;  %v1010_v36 = vmul.f32 %v1009_v1, %v1006_v33  ;;  %v1021_v37 = vadd.f32 1.0, %v1615_v30 }
 0x159   : > { %v1619_v17 = vpop.eup %1618  ;;  %v1016_v43 = vmul.f32 %v1015_v53, %v1012_v13  ;;  %v1027_v44 = vadd.f32 1.0, %v1617_v40 }
 0x15a   : > { %v1621_v5 = vpop.eup %1620  ;;  %v1011_v56 = vmul.f32 %v1607_v24, %v1010_v36  ;;  %v1022_v49 = vmul.f32 %v1021_v37, %v1018_v28 }
 0x15b   : > { %v1017_v48 = vmul.f32 %v1609_v11, %v1016_v43  ;;  %v1028_v54 = vmul.f32 %v1027_v44, %v1024_v31 }
 0x15c   : > { %v1023_v21 = vmul.f32 %v1619_v17, %v1022_v49  ;;  %v1031_v61 = vmul.f32 %v1030_v57, %v1011_v56  ;;  %v1043_v62 = vmul.f32 %v1042_v29, %v1011_v56  ;;  %v1056_v23 = vmul.f32 %v1055_v38, %v1011_v56 }
 0x15d   : > { %v1029_v63 = vmul.f32 %v1621_v5, %v1028_v54  ;;  %v1033_v3 = vmul.f32 %v1032_v26, %v1017_v48  ;;  %v1045_v4 = vmul.f32 %v1044_v47, %v1017_v48  ;;  %v1058_v6 = vmul.f32 %v1057_v39, %v1017_v48 }
 0x15e   : > { %v1036_v7 = vmul.f32 %v1035_v27, %v1023_v21  ;;  %v1048_v9 = vmul.f32 %v1047_v32, %v1023_v21  ;;  %v1061_v8 = vmul.f32 %v1060_v45, %v1023_v21  ;;  %v1069_v10 = vmul.f32 %v1068_v50, %v1011_v56 }
 0x15f   : > { %v1034_v14 = vadd.f32 %v1033_v3, %v1031_v61  ;;  %v1039_v15 = vmul.f32 %v1038_v12, %v1029_v63  ;;  %v1046_v41 = vadd.f32 %v1045_v4, %v1043_v62  ;;  %v1051_v16 = vmul.f32 %v1050_v35, %v1029_v63 }
 0x160   : > { %v1059_v18 = vadd.f32 %v1058_v6, %v1056_v23  ;;  %v1064_v19 = vmul.f32 %v1063_v46, %v1029_v63  ;;  %v1071_v20 = vmul.f32 %v1070_v51, %v1017_v48  ;;  %v1074_v60 = vmul.f32 %v1073_v55, %v1023_v21 }
 0x161   : > { %v1037_v2 = vadd.f32 %v1036_v7, %v1034_v14  ;;  %v1049_v34 = vadd.f32 %v1048_v9, %v1046_v41  ;;  %v1077_v59 = vmul.f32 %v1076_v58, %v1029_v63 }
 0x162   : > { %v1062_v42 = vadd.f32 %v1061_v8, %v1059_v18  ;;  %v1072_v52 = vadd.f32 %v1071_v20, %v1069_v10 }
 0x163   : > { %v1040_v22 = vadd.f32 %v1039_v15, %v1037_v2  ;;  %v1052_v24 = vadd.f32 %v1051_v16, %v1049_v34 }
 0x164   : > { %v1065_v11 = vadd.f32 %v1064_v19, %v1062_v42  ;;  %v1075_v33 = vadd.f32 %v1074_v60, %v1072_v52 }
 0x165   : > { %1041 = vst [vmem:[%s566_s13] sm:$0xf] %v1040_v22  ;;  %1435 = vst [vmem:[%s566_s13 + $0x4] sm:$0xf] %v1052_v24 }
 0x166   : > { %1436 = vst [vmem:[%s566_s13 + $0x8] sm:$0xf] %v1065_v11  ;;  %v1078_v57 = vadd.f32 %v1077_v59, %v1075_v33 }
 0x168   : > { %1437 = vst [vmem:[%s566_s13 + $0xc] sm:$0xf] %v1078_v57 }
 0x169   : > { %1830 = shalt.err (!%p1827_p6)
}
 0x16a   : > { %s1831_s20 = scalar_lea.hbm %s2783_s15, 256  ;;  %s1835_s25 = scalar_lea.hbm %s2914_s26, 512 }
 0x16b   : > { %p1832_p11 = scmp.ne.s32.totalorder %s2783_s15, %s1831_s20  ;;  %p1836_p8 = scmp.lt.u32.totalorder %s2783_s15, %s2914_s26 }
 0x16c   : > { %p1837_p4 = scmp.lt.u32.totalorder %s1835_s25, %s1831_s20  ;;  %p1839_p0 = scmp.lt.u32.totalorder %s1831_s20, %s2783_s15 }
 0x16d   : > { %p1833_p2 = pnand %p1832_p11, %p2915_p1 }
 0x16e   : > { %p1838_p10 = por %p1837_p4, %p1836_p8 }
 0x16f   : > { %p1834_p5 = pneg %p1833_p2 }
 0x170   : > { %p1840_p12 = por %p1839_p0, %p1838_p10 }
 0x172   : > { %p1841_p13 = pnand %p1840_p12, %p1834_p5 }
 0x174   : > { %1844 = shalt.err (!%p1841_p13)
}
 0x175   : > { %s1934_s30 = smov 64   ;;  %s1935_s1 = smov 4  }
 0x176   : > { %1481 = dma.vmem_to_hbm [thread:$0]  (%p2915_p1), %s2785_s10, 256, %s2783_s15, %s1082_s18, %s1934_s30, %s1934_s30, %s1935_s1  }
 0x177 PF: > { %s2916_s19 = sld [smem:[#allocation27_spill]]  ;;  %s2917_s21 = sld [smem:[#allocation35_spill]] }
 0x178   : > { %s2918_s13 = sld [smem:[#allocation30_spill]] }
 0x17d   : > { %s1111_s29 = sand.u32 1, %s2916_s19   ;;  %p2919_p7 = scmp.ne.s32.totalorder %s2917_s21, 0 }
 0x17e   : > { %p2920_p9 = scmp.ge.s32.totalorder %s2918_s13, 2  ;;  %s1112_s11 = scalar_lea.sflag [#allocation4], %s1111_s29 }
 0x180   : > { %p1516_p3 = pnand %p2920_p9, %p2919_p7 }
 0x182   : > { %1894 = dma.done.wait (!%p1516_p3), %s1112_s11, 256  }
 0x183   : > { %1896 = vsyncadd (!%p1516_p3), %s1112_s11, 4294967040  ;;  %s33_s18 = sadd.s32 1, %s2918_s13   ;;  %s2921_s4 = sld [smem:[#allocation28_spill]] }
 0x184   : > { %p30_p6 = scmp.ge.s32.totalorder %s33_s18, 4   ;;  %s2922_s15 = sld [smem:[#allocation34_spill]] }
 0x185   : > { %s2923_s6 = sld [smem:[#allocation32_spill]]  ;;  %s2924_s13 = smov %s1903_s14 }
 0x186   : > { %s2926_s16 = smov %s1915_s17  ;;  %32 = sbr.rel (!%p30_p6) target bundleno = 18 (0x12), region = 174 }
 0x189   : > { %s2925_s14 = smov %s2921_s4 }
 0x18b   : > { %s2927_s17 = smov %s2923_s6 }
 0x18d   :  { %1117 = vsyncpa [#allocation3], 1 }
 0x18e   :  { %1119 = vsyncpa [#allocation3 + $0x1], 1 }
 0x18f   :  { %1120 = vsyncpa [#allocation7], 1 }
 0x190   :  { %1122 = vsyncpa [#allocation7 + $0x1], 1 }
 0x191   :  { %1123 = vsyncpa [#allocation4], 1 }
 0x192   :  { %1125 = vsyncpa [#allocation4 + $0x1], 1 }
 0x193   :  { %1126 = vsyncpa [#allocation5], 1 }
 0x194   :  { %1128 = vsyncpa [#allocation5 + $0x1], 1 }
 0x195   :  { %1129 = vsyncpa [#allocation11], 1 }
 0x196   :  { %1130 = vsyncpa [#allocation14], 1 }
 0x197   :  { %1131 = vsyncpa [#allocation17], 1 }

</bundles_post_ra>
